<compile_context>
chip_gen: v7x
topology: tpu7x:2x2x1
jax: 0.10.0
libtpu: 0.0.40
codegen_flags: <defaults>
</compile_context>

<pallas_src>
import functools

import jax
import jax.numpy as jnp
from jax.experimental import pallas as pl
from jax.experimental.pallas import tpu as pltpu

_EPS = 1e-5


# ----------------------------------------------------------------------------
# Pallas kernels
# ----------------------------------------------------------------------------
def _matmul_bias_lrelu_kernel(p_ref, w_ref, b_ref, o_ref):
    """o = LeakyReLU_0.2(p @ w + b). Operands may be bf16; accumulate in f32."""
    acc = jnp.dot(p_ref[...], w_ref[...], preferred_element_type=jnp.float32)
    acc = acc + b_ref[...]
    o_ref[...] = jnp.maximum(acc, 0.2 * acc).astype(o_ref.dtype)


def _matmul_bias_stats_kernel(p_ref, w_ref, b_ref, y_ref, sum_ref, sq_ref):
    """BN pass A: y = p @ w + b (f32) plus resident per-channel sum / sumsq.

    sum_ref / sq_ref keep the same (0, 0) block across the row grid, so they
    stay VMEM-resident; the row axis is a reduction ("arbitrary")."""
    @pl.when(pl.program_id(0) == 0)
    def _():
        sum_ref[...] = jnp.zeros_like(sum_ref)
        sq_ref[...] = jnp.zeros_like(sq_ref)

    acc = jnp.dot(p_ref[...], w_ref[...], preferred_element_type=jnp.float32)
    acc = acc + b_ref[...]
    y_ref[...] = acc
    sum_ref[...] += jnp.sum(acc, axis=0, keepdims=True)
    sq_ref[...] += jnp.sum(acc * acc, axis=0, keepdims=True)


def _bn_lrelu_apply_kernel(y_ref, sc_ref, sh_ref, o_ref):
    """BN pass B: o = LeakyReLU_0.2(y * scale + shift); all f32 math."""
    z = y_ref[...] * sc_ref[...] + sh_ref[...]
    o_ref[...] = jnp.maximum(z, 0.2 * z).astype(o_ref.dtype)


def _head_kernel(y_ref, sc_ref, sh_ref, w4_ref, b4_ref, o_ref, *, spatial):
    """BN pass B for conv3, then conv4 (4x4 valid, Cout=1) + exact sigmoid.

    Conv4 is a full contraction over (spatial, C3) per sample, done as a VPU
    broadcast-multiply, a sublane (spatial) reduce first so the intermediate
    stays lane-dense, then a lane (channel) reduce.
    """
    z = y_ref[...] * sc_ref[...] + sh_ref[...]
    z = jnp.maximum(z, 0.2 * z)                        # [tile_n*spatial, C3] f32
    tile_n = z.shape[0] // spatial
    z3 = z.reshape(tile_n, spatial, z.shape[-1])       # split leading dim only
    prod = z3 * w4_ref[...]                            # bcast [spatial, C3]
    s = jnp.sum(prod, axis=1)                          # sublane reduce -> [tile_n, C3]
    logit = jnp.sum(s, axis=-1, keepdims=True) + b4_ref[...]   # [tile_n, 1]
    # Exact sigmoid (output is tiny; approx reciprocal is not worth the error).
    o_ref[...] = (1.0 / (1.0 + jnp.exp(-logit))).astype(o_ref.dtype)


# ----------------------------------------------------------------------------
# pallas_call wrappers
# ----------------------------------------------------------------------------
def _pick_row_tile(r, cap, min_steps=1):
    """Largest divisor of r that is <= cap and sublane-aligned (multiple of 8).

    Falls back to the full extent r (single block, full-dim block shape) when no
    aligned divisor exists below the cap.
    """
    cap = max(1, min(cap, r // min_steps if r >= min_steps else r))
    if cap >= r:
        return r
    for t in range(cap, 0, -1):
        if r % t == 0 and t % 8 == 0:
            return t
    return r


def pallas_conv_lrelu(p, w, b):
    """Conv1: row-gridded matmul + bias + LeakyReLU (no BN)."""
    r, k = p.shape
    cout = w.shape[1]
    # >= 2 grid steps so ("parallel",) can shard across v7x's 2 TensorCores
    # even at small batch.
    tile_r = _pick_row_tile(r, cap=2048, min_steps=2)
    out_dtype = p.dtype
    bytes_acc = int(p.size * p.dtype.itemsize + w.size * w.dtype.itemsize
                    + b.size * b.dtype.itemsize
                    + r * cout * jnp.dtype(out_dtype).itemsize)
    # TODO(synk): if hidden_dim < 32, pad Cout to a multiple of 128 (lane-dense
    # vst) and zero-pad the next layer's weight rows; not needed for H >= 128.
    return pl.pallas_call(
        _matmul_bias_lrelu_kernel,
        out_shape=jax.ShapeDtypeStruct((r, cout), out_dtype),
        grid=(r // tile_r,),
        in_specs=[
            pl.BlockSpec((tile_r, k), lambda i: (i, 0)),
            pl.BlockSpec((k, cout), lambda i: (0, 0)),
            pl.BlockSpec((1, cout), lambda i: (0, 0)),
        ],
        out_specs=pl.BlockSpec((tile_r, cout), lambda i: (i, 0)),
        compiler_params=pltpu.CompilerParams(
            dimension_semantics=("parallel",)),
        cost_estimate=pl.CostEstimate(flops=2 * r * k * cout, transcendentals=0,
                                      bytes_accessed=bytes_acc),
    )(p, w, b)


def pallas_conv_bn_stats(p, w, b):
    """BN pass A: tiled matmul -> f32 pre-BN activation + per-channel stats."""
    r, k = p.shape
    cout = w.shape[1]
    tile_r = _pick_row_tile(r, cap=2048, min_steps=1)
    bytes_acc = int(p.size * p.dtype.itemsize + w.size * w.dtype.itemsize
                    + b.size * b.dtype.itemsize + r * cout * 4 + 2 * cout * 4)
    return pl.pallas_call(
        _matmul_bias_stats_kernel,
        out_shape=(jax.ShapeDtypeStruct((r, cout), jnp.float32),
                   jax.ShapeDtypeStruct((1, cout), jnp.float32),
                   jax.ShapeDtypeStruct((1, cout), jnp.float32)),
        grid=(r // tile_r,),
        in_specs=[
            pl.BlockSpec((tile_r, k), lambda i: (i, 0)),
            pl.BlockSpec((k, cout), lambda i: (0, 0)),
            pl.BlockSpec((1, cout), lambda i: (0, 0)),
        ],
        out_specs=(pl.BlockSpec((tile_r, cout), lambda i: (i, 0)),
                   pl.BlockSpec((1, cout), lambda i: (0, 0)),
                   pl.BlockSpec((1, cout), lambda i: (0, 0))),
        compiler_params=pltpu.CompilerParams(
            dimension_semantics=("arbitrary",)),   # stats = reduction over rows
        cost_estimate=pl.CostEstimate(flops=2 * r * k * cout, transcendentals=0,
                                      bytes_accessed=bytes_acc),
    )(p, w, b)


def pallas_bn_lrelu_apply(y, scale, shift, out_dtype):
    """BN pass B: tiled normalize + gamma/beta + LeakyReLU."""
    r, cout = y.shape
    tile_r = _pick_row_tile(r, cap=4096, min_steps=2)
    return pl.pallas_call(
        _bn_lrelu_apply_kernel,
        out_shape=jax.ShapeDtypeStruct((r, cout), out_dtype),
        grid=(r // tile_r,),
        in_specs=[
            pl.BlockSpec((tile_r, cout), lambda i: (i, 0)),
            pl.BlockSpec((1, cout), lambda i: (0, 0)),
            pl.BlockSpec((1, cout), lambda i: (0, 0)),
        ],
        out_specs=pl.BlockSpec((tile_r, cout), lambda i: (i, 0)),
        compiler_params=pltpu.CompilerParams(
            dimension_semantics=("parallel",)),
    )(y, scale, shift)


def pallas_bn_lrelu_conv4_sigmoid(y, scale, shift, w4, b4, *, n, spatial):
    """Head: BN pass B for conv3 + conv4 (4x4 valid) + sigmoid, gridded on batch."""
    c3 = y.shape[1]
    tile_n = _pick_row_tile(n, cap=256, min_steps=1)
    return pl.pallas_call(
        functools.partial(_head_kernel, spatial=spatial),
        out_shape=jax.ShapeDtypeStruct((n, 1), jnp.float32),
        grid=(n // tile_n,),
        in_specs=[
            pl.BlockSpec((tile_n * spatial, c3), lambda i: (i, 0)),
            pl.BlockSpec((1, c3), lambda i: (0, 0)),
            pl.BlockSpec((1, c3), lambda i: (0, 0)),
            pl.BlockSpec((spatial, c3), lambda i: (0, 0)),
            pl.BlockSpec((1, 1), lambda i: (0, 0)),
        ],
        out_specs=pl.BlockSpec((tile_n, 1), lambda i: (i, 0)),
        compiler_params=pltpu.CompilerParams(
            dimension_semantics=("parallel",)),
    )(y, scale, shift, w4, b4)


def _bn_scale_shift(row_sum, row_sq, num_rows, gamma, beta):
    """Training-mode BN (biased variance) folded into per-channel scale/shift."""
    mean = row_sum / num_rows
    var = jnp.maximum(row_sq / num_rows - mean * mean, 0.0)
    scale = gamma * jax.lax.rsqrt(var + _EPS)
    shift = beta - mean * scale
    return scale, shift


# ----------------------------------------------------------------------------
# Plain-JAX glue: im2col patch extraction and one-time weight packing
# ----------------------------------------------------------------------------
def im2col(x_nhwc, k, stride, pad):
    """x:[N,H,W,C] -> patches [N*Ho*Wo, k*k*C] ordered (ki, kj, cin)."""
    n, h, w, c = x_nhwc.shape
    xp = jnp.pad(x_nhwc, ((0, 0), (pad, pad), (pad, pad), (0, 0)))
    ho = (h + 2 * pad - k) // stride + 1
    wo = (w + 2 * pad - k) // stride + 1
    slabs = []
    for i in range(k):
        for j in range(k):
            slabs.append(xp[:, i:i + stride * ho:stride, j:j + stride * wo:stride, :])
    p = jnp.stack(slabs, axis=3)                      # [N,Ho,Wo,k*k,C]
    return p.reshape(n * ho * wo, k * k * c), (n, ho, wo)
    # TODO(synk): fuse im2col into the kernels (16 shifted in-VMEM views feeding
    # K=C matmul accumulations) to avoid the 4x-inflated patch-matrix HBM trip.


def conv_weight_to_mat(w_oihw, dtype):
    """PyTorch conv weight [Cout,Cin,K,K] -> matmul weight [K*K*Cin, Cout]."""
    cout, cin, k, _ = w_oihw.shape
    return jnp.transpose(w_oihw, (2, 3, 1, 0)).reshape(k * k * cin, cout).astype(dtype)


def pack_params(params, compute_dtype=jnp.bfloat16):
    """One-time repack of PyTorch-layout params (hoisted out of the forward).

    Matmul operands (conv weights, and activations/patches by inheritance) use
    `compute_dtype` (bf16 is MXU-native on v5e/v6e/v7x); bias / BN / head
    parameters stay f32 and all post-matmul math is f32.
    """
    f32 = jnp.float32
    return {
        "w1": conv_weight_to_mat(params["w1"], compute_dtype),
        "b1": params["b1"].reshape(1, -1).astype(f32),
        "w2": conv_weight_to_mat(params["w2"], compute_dtype),
        "b2": params["b2"].reshape(1, -1).astype(f32),
        "g2": params["g2"].reshape(1, -1).astype(f32),
        "be2": params["be2"].reshape(1, -1).astype(f32),
        "w3": conv_weight_to_mat(params["w3"], compute_dtype),
        "b3": params["b3"].reshape(1, -1).astype(f32),
        "g3": params["g3"].reshape(1, -1).astype(f32),
        "be3": params["be3"].reshape(1, -1).astype(f32),
        # Conv4 weight [1,C3,4,4] -> [16, C3], row index = ki*4 + kj. Applied on
        # the VPU against the f32 post-BN activation, so keep it f32.
        "w4": jnp.transpose(params["w4"][0], (1, 2, 0)).reshape(16, -1).astype(f32),
        "b4": params["b4"].reshape(1, 1).astype(f32),
    }


# ----------------------------------------------------------------------------
# Discriminator forward (arch='cnn')
# ----------------------------------------------------------------------------
def discriminator_forward(x_nchw, pk):
    compute_dtype = pk["w1"].dtype
    x = jnp.transpose(x_nchw, (0, 2, 3, 1)).astype(compute_dtype)   # NHWC

    # Conv1 (C -> H, 4, s2, p1) + LeakyReLU (row-gridded, parallel)
    p, (n, ho, wo) = im2col(x, 4, 2, 1)
    y = pallas_conv_lrelu(p, pk["w1"], pk["b1"])
    x = y.reshape(n, ho, wo, -1)

    # Conv2 (H -> 2H) + BatchNorm2d (training mode, two-pass) + LeakyReLU
    p, (n, ho, wo) = im2col(x, 4, 2, 1)
    y2, s2, q2 = pallas_conv_bn_stats(p, pk["w2"], pk["b2"])
    sc2, sh2 = _bn_scale_shift(s2, q2, p.shape[0], pk["g2"], pk["be2"])
    a2 = pallas_bn_lrelu_apply(y2, sc2, sh2, out_dtype=compute_dtype)
    x = a2.reshape(n, ho, wo, -1)

    # Conv3 (2H -> 4H) + BN + LReLU + Conv4 (4H -> 1, 4x4 valid) + Sigmoid
    p, (n, ho, wo) = im2col(x, 4, 2, 1)
    y3, s3, q3 = pallas_conv_bn_stats(p, pk["w3"], pk["b3"])
    sc3, sh3 = _bn_scale_shift(s3, q3, p.shape[0], pk["g3"], pk["be3"])
    out = pallas_bn_lrelu_conv4_sigmoid(y3, sc3, sh3, pk["w4"], pk["b4"],
                                        n=n, spatial=ho * wo)

    # .view(-1, 1).squeeze(1)  -> shape (N,)
    return out.reshape(-1)
    # TODO(synk): BatchNorm running_mean/var updates (training-state
    # bookkeeping) are not part of the returned forward value and are omitted.


# ----------------------------------------------------------------------------
# Pure-JAX reference (for the self-check) and deterministic params
# ----------------------------------------------------------------------------
def _reference_forward(x_nchw, params):
    x = jnp.transpose(x_nchw, (0, 2, 3, 1)).astype(jnp.float32)

    def conv(h, w, b, stride, pad):
        y = jax.lax.conv_general_dilated(
            h, jnp.transpose(w, (2, 3, 1, 0)), (stride, stride),
            [(pad, pad), (pad, pad)],
            dimension_numbers=("NHWC", "HWIO", "NHWC"))
        return y + b

    def bn(h, g, be):
        mean = jnp.mean(h, axis=(0, 1, 2), keepdims=True)
        var = jnp.mean((h - mean) ** 2, axis=(0, 1, 2), keepdims=True)
        return (h - mean) * jax.lax.rsqrt(var + _EPS) * g + be

    lrelu = lambda v: jnp.maximum(v, 0.2 * v)
    h = lrelu(conv(x, params["w1"], params["b1"], 2, 1))
    h = lrelu(bn(conv(h, params["w2"], params["b2"], 2, 1), params["g2"], params["be2"]))
    h = lrelu(bn(conv(h, params["w3"], params["b3"], 2, 1), params["g3"], params["be3"]))
    h = conv(h, params["w4"], params["b4"], 1, 0)
    return jax.nn.sigmoid(h).reshape(-1)


def make_params(key, num_channels, hidden_dim):
    ks = jax.random.split(key, 12)
    h = hidden_dim

    def w(k, shape, scale=0.05):
        return scale * jax.random.normal(k, shape, dtype=jnp.float32)

    return {
        "w1": w(ks[0], (h, num_channels, 4, 4)),
        "b1": w(ks[1], (h,)),
        "w2": w(ks[2], (2 * h, h, 4, 4)),
        "b2": w(ks[3], (2 * h,)),
        "g2": 1.0 + w(ks[4], (2 * h,)),
        "be2": w(ks[5], (2 * h,)),
        "w3": w(ks[6], (4 * h, 2 * h, 4, 4)),
        "b3": w(ks[7], (4 * h,)),
        "g3": 1.0 + w(ks[8], (4 * h,)),
        "be3": w(ks[9], (4 * h,)),
        "w4": w(ks[10], (1, 4 * h, 4, 4)),
        "b4": w(ks[11], (1,)),
    }


# ----------------------------------------------------------------------------
if __name__ == "__main__":
    key = jax.random.PRNGKey(0)
    k_x, k_p = jax.random.split(key)

    batch, num_channels, hidden_dim = 2, 3, 8
    # Spatial size is fixed to 32x32 by the architecture (the final 4x4 valid
    # conv must see a 4x4 feature map); input_dim = num_channels*32*32.
    x = jax.random.normal(k_x, (batch, num_channels, 32, 32), dtype=jnp.float32)
    params = make_params(k_p, num_channels, hidden_dim)

    fwd = jax.jit(discriminator_forward)
    ref = jax.block_until_ready(_reference_forward(x, params))

    # f32 matmul operands: structural correctness at tight tolerance.
    out_f32 = jax.block_until_ready(fwd(x, pack_params(params, jnp.float32)))
    assert out_f32.shape == (batch,), out_f32.shape
    assert bool(jnp.all(jnp.isfinite(out_f32)))
    assert bool(jnp.allclose(out_f32, ref, atol=1e-4, rtol=1e-4)), (out_f32, ref)

    # bf16 matmul operands (MXU-native perf configuration): f32 accumulation
    # and f32 BN/LReLU/sigmoid math; looser tolerance from bf16 rounding.
    out_bf16 = jax.block_until_ready(fwd(x, pack_params(params, jnp.bfloat16)))
    assert out_bf16.shape == (batch,), out_bf16.shape
    assert bool(jnp.all(jnp.isfinite(out_bf16)))
    assert bool(jnp.all((out_bf16 > 0.0) & (out_bf16 < 1.0)))
    assert bool(jnp.allclose(out_bf16, ref, atol=2e-2, rtol=2e-2)), (out_bf16, ref)

    print("KERNEL_OK")
</pallas_src>

<mosaic_0001>
module attributes {stable_mosaic.version = 11 : i64} {
  func.func @_matmul_bias_lrelu_kernel(%arg0: i32, %arg1: memref<256x48xf32, #tpu.memory_space<vmem>>, %arg2: memref<48x8xf32, #tpu.memory_space<vmem>>, %arg3: memref<1x8xf32, #tpu.memory_space<vmem>>, %arg4: memref<256x8xf32, #tpu.memory_space<vmem>>) attributes {dimension_semantics = [#tpu.dimension_semantics<parallel>], iteration_bounds = array<i64: 2>, scalar_prefetch = 0 : i64, scratch_operands = 0 : i64, tpu.core_type = #tpu.core_type<tc>, window_params = [{transform_indices = @transform_0, window_bounds = array<i64: 256, 48>}, {pipeline_mode = #tpu.pipeline_mode<synchronous>, transform_indices = @transform_1, window_bounds = array<i64: 48, 8>}, {pipeline_mode = #tpu.pipeline_mode<synchronous>, transform_indices = @transform_2, window_bounds = array<i64: 1, 8>}, {transform_indices = @transform_3, window_bounds = array<i64: 256, 8>}]} {
    %c0 = arith.constant 0 : index
    %c0_0 = arith.constant 0 : index
    %0 = vector.load %arg1[%c0, %c0_0] : memref<256x48xf32, #tpu.memory_space<vmem>>, vector<256x48xf32>
    %c0_1 = arith.constant 0 : index
    %c0_2 = arith.constant 0 : index
    %1 = vector.load %arg2[%c0_1, %c0_2] : memref<48x8xf32, #tpu.memory_space<vmem>>, vector<48x8xf32>
    %cst = arith.constant dense<0.000000e+00> : vector<256x8xf32>
    %2 = tpu.matmul %0, %1, %cst {dimension_numbers = #tpu.dot_dimension_numbers<[1], [0], [0], [1], [0, 0, 1, 1], [], []>} : vector<256x48xf32>, vector<48x8xf32>, vector<256x8xf32> -> vector<256x8xf32>
    %c0_3 = arith.constant 0 : index
    %c0_4 = arith.constant 0 : index
    %3 = vector.load %arg3[%c0_3, %c0_4] : memref<1x8xf32, #tpu.memory_space<vmem>>, vector<1x8xf32>
    %4 = vector.broadcast %3 : vector<1x8xf32> to vector<256x8xf32>
    %5 = arith.addf %2, %4 : vector<256x8xf32>
    %cst_5 = arith.constant 2.000000e-01 : f32
    %6 = vector.broadcast %cst_5 : f32 to vector<256x8xf32>
    %7 = arith.mulf %6, %5 : vector<256x8xf32>
    %8 = arith.maximumf %5, %7 : vector<256x8xf32>
    %c0_6 = arith.constant 0 : index
    %c0_7 = arith.constant 0 : index
    %9 = vector.load %arg4[%c0_6, %c0_7] : memref<256x8xf32, #tpu.memory_space<vmem>>, vector<256x8xf32>
    tpu.vector_store %arg4[%c0_6, %c0_7], %8 {strides = array<i32>} : memref<256x8xf32, #tpu.memory_space<vmem>>, vector<256x8xf32>,
    return
  }
  func.func @transform_0(%arg0: i32) -> (i32, i32) {
    %c0_i32 = arith.constant 0 : i32
    %c0_i32_0 = arith.constant 0 : i32
    return %arg0, %c0_i32 : i32, i32
  }
  func.func @transform_1(%arg0: i32) -> (i32, i32) {
    %c0_i32 = arith.constant 0 : i32
    %c0_i32_0 = arith.constant 0 : i32
    %c0_i32_1 = arith.constant 0 : i32
    return %c0_i32, %c0_i32_0 : i32, i32
  }
  func.func @transform_2(%arg0: i32) -> (i32, i32) {
    %c0_i32 = arith.constant 0 : i32
    %c0_i32_0 = arith.constant 0 : i32
    %c0_i32_1 = arith.constant 0 : i32
    return %c0_i32, %c0_i32_0 : i32, i32
  }
  func.func @transform_3(%arg0: i32) -> (i32, i32) {
    %c0_i32 = arith.constant 0 : i32
    %c0_i32_0 = arith.constant 0 : i32
    return %arg0, %c0_i32 : i32, i32
  }
}

module attributes {stable_mosaic.version = 11 : i64} {
  func.func @_matmul_bias_stats_kernel(%arg0: i32, %arg1: memref<128x128xf32, #tpu.memory_space<vmem>>, %arg2: memref<128x16xf32, #tpu.memory_space<vmem>>, %arg3: memref<1x16xf32, #tpu.memory_space<vmem>>, %arg4: memref<128x16xf32, #tpu.memory_space<vmem>>, %arg5: memref<1x16xf32, #tpu.memory_space<vmem>>, %arg6: memref<1x16xf32, #tpu.memory_space<vmem>>) attributes {dimension_semantics = [#tpu.dimension_semantics<arbitrary>], iteration_bounds = array<i64: 1>, scalar_prefetch = 0 : i64, scratch_operands = 0 : i64, tpu.core_type = #tpu.core_type<tc>, window_params = [{transform_indices = @transform_0, window_bounds = array<i64: 128, 128>}, {pipeline_mode = #tpu.pipeline_mode<synchronous>, transform_indices = @transform_1, window_bounds = array<i64: 128, 16>}, {pipeline_mode = #tpu.pipeline_mode<synchronous>, transform_indices = @transform_2, window_bounds = array<i64: 1, 16>}, {transform_indices = @transform_3, window_bounds = array<i64: 128, 16>}, {pipeline_mode = #tpu.pipeline_mode<synchronous>, transform_indices = @transform_4, window_bounds = array<i64: 1, 16>}, {pipeline_mode = #tpu.pipeline_mode<synchronous>, transform_indices = @transform_5, window_bounds = array<i64: 1, 16>}]} {
    %c0_i32 = arith.constant 0 : i32
    %0 = arith.cmpi eq, %arg0, %c0_i32 : i32
    %1 = arith.extui %0 : i1 to i32
    %c0_i32_0 = arith.constant 0 : i32
    %2 = arith.cmpi ne, %1, %c0_i32_0 : i32
    scf.if %2 {
      %cst_18 = arith.constant 0.000000e+00 : f32
      %21 = vector.broadcast %cst_18 : f32 to vector<1x16xf32>
      %c0_19 = arith.constant 0 : index
      %c0_20 = arith.constant 0 : index
      %22 = vector.load %arg5[%c0_19, %c0_20] : memref<1x16xf32, #tpu.memory_space<vmem>>, vector<1x16xf32>
      tpu.vector_store %arg5[%c0_19, %c0_20], %21 {strides = array<i32>} : memref<1x16xf32, #tpu.memory_space<vmem>>, vector<1x16xf32>,
      %cst_21 = arith.constant 0.000000e+00 : f32
      %23 = vector.broadcast %cst_21 : f32 to vector<1x16xf32>
      %c0_22 = arith.constant 0 : index
      %c0_23 = arith.constant 0 : index
      %24 = vector.load %arg6[%c0_22, %c0_23] : memref<1x16xf32, #tpu.memory_space<vmem>>, vector<1x16xf32>
      tpu.vector_store %arg6[%c0_22, %c0_23], %23 {strides = array<i32>} : memref<1x16xf32, #tpu.memory_space<vmem>>, vector<1x16xf32>,
    } else {
    }
    %c0 = arith.constant 0 : index
    %c0_1 = arith.constant 0 : index
    %3 = vector.load %arg1[%c0, %c0_1] : memref<128x128xf32, #tpu.memory_space<vmem>>, vector<128x128xf32>
    %c0_2 = arith.constant 0 : index
    %c0_3 = arith.constant 0 : index
    %4 = vector.load %arg2[%c0_2, %c0_3] : memref<128x16xf32, #tpu.memory_space<vmem>>, vector<128x16xf32>
    %cst = arith.constant dense<0.000000e+00> : vector<128x16xf32>
    %5 = tpu.matmul %3, %4, %cst {dimension_numbers = #tpu.dot_dimension_numbers<[1], [0], [0], [1], [0, 0, 1, 1], [], []>} : vector<128x128xf32>, vector<128x16xf32>, vector<128x16xf32> -> vector<128x16xf32>
    %c0_4 = arith.constant 0 : index
    %c0_5 = arith.constant 0 : index
    %6 = vector.load %arg3[%c0_4, %c0_5] : memref<1x16xf32, #tpu.memory_space<vmem>>, vector<1x16xf32>
    %7 = vector.broadcast %6 : vector<1x16xf32> to vector<128x16xf32>
    %8 = arith.addf %5, %7 : vector<128x16xf32>
    %c0_6 = arith.constant 0 : index
    %c0_7 = arith.constant 0 : index
    %9 = vector.load %arg4[%c0_6, %c0_7] : memref<128x16xf32, #tpu.memory_space<vmem>>, vector<128x16xf32>
    tpu.vector_store %arg4[%c0_6, %c0_7], %8 {strides = array<i32>} : memref<128x16xf32, #tpu.memory_space<vmem>>, vector<128x16xf32>,
    %c0_8 = arith.constant 0 : index
    %c0_9 = arith.constant 0 : index
    %10 = vector.load %arg5[%c0_8, %c0_9] : memref<1x16xf32, #tpu.memory_space<vmem>>, vector<1x16xf32>
    %cst_10 = arith.constant dense<0.000000e+00> : vector<16xf32>
    %11 = vector.multi_reduction <add>, %8, %cst_10 [0] : vector<128x16xf32> to vector<16xf32>
    %12 = vector.shape_cast %11 : vector<16xf32> to vector<1x16xf32>
    %13 = arith.addf %10, %12 : vector<1x16xf32>
    %c0_11 = arith.constant 0 : index
    %c0_12 = arith.constant 0 : index
    %14 = vector.load %arg5[%c0_11, %c0_12] : memref<1x16xf32, #tpu.memory_space<vmem>>, vector<1x16xf32>
    tpu.vector_store %arg5[%c0_11, %c0_12], %13 {strides = array<i32>} : memref<1x16xf32, #tpu.memory_space<vmem>>, vector<1x16xf32>,
    %c0_13 = arith.constant 0 : index
    %c0_14 = arith.constant 0 : index
    %15 = vector.load %arg6[%c0_13, %c0_14] : memref<1x16xf32, #tpu.memory_space<vmem>>, vector<1x16xf32>
    %16 = arith.mulf %8, %8 : vector<128x16xf32>
    %cst_15 = arith.constant dense<0.000000e+00> : vector<16xf32>
    %17 = vector.multi_reduction <add>, %16, %cst_15 [0] : vector<128x16xf32> to vector<16xf32>
    %18 = vector.shape_cast %17 : vector<16xf32> to vector<1x16xf32>
    %19 = arith.addf %15, %18 : vector<1x16xf32>
    %c0_16 = arith.constant 0 : index
    %c0_17 = arith.constant 0 : index
    %20 = vector.load %arg6[%c0_16, %c0_17] : memref<1x16xf32, #tpu.memory_space<vmem>>, vector<1x16xf32>
    tpu.vector_store %arg6[%c0_16, %c0_17], %19 {strides = array<i32>} : memref<1x16xf32, #tpu.memory_space<vmem>>, vector<1x16xf32>,
    return
  }
  func.func @transform_0(%arg0: i32) -> (i32, i32) {
    %c0_i32 = arith.constant 0 : i32
    %c0_i32_0 = arith.constant 0 : i32
    return %arg0, %c0_i32 : i32, i32
  }
  func.func @transform_1(%arg0: i32) -> (i32, i32) {
    %c0_i32 = arith.constant 0 : i32
    %c0_i32_0 = arith.constant 0 : i32
    %c0_i32_1 = arith.constant 0 : i32
    return %c0_i32, %c0_i32_0 : i32, i32
  }
  func.func @transform_2(%arg0: i32) -> (i32, i32) {
    %c0_i32 = arith.constant 0 : i32
    %c0_i32_0 = arith.constant 0 : i32
    %c0_i32_1 = arith.constant 0 : i32
    return %c0_i32, %c0_i32_0 : i32, i32
  }
  func.func @transform_3(%arg0: i32) -> (i32, i32) {
    %c0_i32 = arith.constant 0 : i32
    %c0_i32_0 = arith.constant 0 : i32
    return %arg0, %c0_i32 : i32, i32
  }
  func.func @transform_4(%arg0: i32) -> (i32, i32) {
    %c0_i32 = arith.constant 0 : i32
    %c0_i32_0 = arith.constant 0 : i32
    %c0_i32_1 = arith.constant 0 : i32
    return %c0_i32, %c0_i32_0 : i32, i32
  }
  func.func @transform_5(%arg0: i32) -> (i32, i32) {
    %c0_i32 = arith.constant 0 : i32
    %c0_i32_0 = arith.constant 0 : i32
    %c0_i32_1 = arith.constant 0 : i32
    return %c0_i32, %c0_i32_0 : i32, i32
  }
}

module attributes {stable_mosaic.version = 11 : i64} {
  func.func @_bn_lrelu_apply_kernel(%arg0: i32, %arg1: memref<64x16xf32, #tpu.memory_space<vmem>>, %arg2: memref<1x16xf32, #tpu.memory_space<vmem>>, %arg3: memref<1x16xf32, #tpu.memory_space<vmem>>, %arg4: memref<64x16xf32, #tpu.memory_space<vmem>>) attributes {dimension_semantics = [#tpu.dimension_semantics<parallel>], iteration_bounds = array<i64: 2>, scalar_prefetch = 0 : i64, scratch_operands = 0 : i64, tpu.core_type = #tpu.core_type<tc>, window_params = [{transform_indices = @transform_0, window_bounds = array<i64: 64, 16>}, {pipeline_mode = #tpu.pipeline_mode<synchronous>, transform_indices = @transform_1, window_bounds = array<i64: 1, 16>}, {pipeline_mode = #tpu.pipeline_mode<synchronous>, transform_indices = @transform_2, window_bounds = array<i64: 1, 16>}, {transform_indices = @transform_3, window_bounds = array<i64: 64, 16>}]} {
    %c0 = arith.constant 0 : index
    %c0_0 = arith.constant 0 : index
    %0 = vector.load %arg1[%c0, %c0_0] : memref<64x16xf32, #tpu.memory_space<vmem>>, vector<64x16xf32>
    %c0_1 = arith.constant 0 : index
    %c0_2 = arith.constant 0 : index
    %1 = vector.load %arg2[%c0_1, %c0_2] : memref<1x16xf32, #tpu.memory_space<vmem>>, vector<1x16xf32>
    %2 = vector.broadcast %1 : vector<1x16xf32> to vector<64x16xf32>
    %3 = arith.mulf %0, %2 : vector<64x16xf32>
    %c0_3 = arith.constant 0 : index
    %c0_4 = arith.constant 0 : index
    %4 = vector.load %arg3[%c0_3, %c0_4] : memref<1x16xf32, #tpu.memory_space<vmem>>, vector<1x16xf32>
    %5 = vector.broadcast %4 : vector<1x16xf32> to vector<64x16xf32>
    %6 = arith.addf %3, %5 : vector<64x16xf32>
    %cst = arith.constant 2.000000e-01 : f32
    %7 = vector.broadcast %cst : f32 to vector<64x16xf32>
    %8 = arith.mulf %7, %6 : vector<64x16xf32>
    %9 = arith.maximumf %6, %8 : vector<64x16xf32>
    %c0_5 = arith.constant 0 : index
    %c0_6 = arith.constant 0 : index
    %10 = vector.load %arg4[%c0_5, %c0_6] : memref<64x16xf32, #tpu.memory_space<vmem>>, vector<64x16xf32>
    tpu.vector_store %arg4[%c0_5, %c0_6], %9 {strides = array<i32>} : memref<64x16xf32, #tpu.memory_space<vmem>>, vector<64x16xf32>,
    return
  }
  func.func @transform_0(%arg0: i32) -> (i32, i32) {
    %c0_i32 = arith.constant 0 : i32
    %c0_i32_0 = arith.constant 0 : i32
    return %arg0, %c0_i32 : i32, i32
  }
  func.func @transform_1(%arg0: i32) -> (i32, i32) {
    %c0_i32 = arith.constant 0 : i32
    %c0_i32_0 = arith.constant 0 : i32
    %c0_i32_1 = arith.constant 0 : i32
    return %c0_i32, %c0_i32_0 : i32, i32
  }
  func.func @transform_2(%arg0: i32) -> (i32, i32) {
    %c0_i32 = arith.constant 0 : i32
    %c0_i32_0 = arith.constant 0 : i32
    %c0_i32_1 = arith.constant 0 : i32
    return %c0_i32, %c0_i32_0 : i32, i32
  }
  func.func @transform_3(%arg0: i32) -> (i32, i32) {
    %c0_i32 = arith.constant 0 : i32
    %c0_i32_0 = arith.constant 0 : i32
    return %arg0, %c0_i32 : i32, i32
  }
}

module attributes {stable_mosaic.version = 11 : i64} {
  func.func @_matmul_bias_stats_kernel(%arg0: i32, %arg1: memref<32x256xf32, #tpu.memory_space<vmem>>, %arg2: memref<256x32xf32, #tpu.memory_space<vmem>>, %arg3: memref<1x32xf32, #tpu.memory_space<vmem>>, %arg4: memref<32x32xf32, #tpu.memory_space<vmem>>, %arg5: memref<1x32xf32, #tpu.memory_space<vmem>>, %arg6: memref<1x32xf32, #tpu.memory_space<vmem>>) attributes {dimension_semantics = [#tpu.dimension_semantics<arbitrary>], iteration_bounds = array<i64: 1>, scalar_prefetch = 0 : i64, scratch_operands = 0 : i64, tpu.core_type = #tpu.core_type<tc>, window_params = [{transform_indices = @transform_0, window_bounds = array<i64: 32, 256>}, {pipeline_mode = #tpu.pipeline_mode<synchronous>, transform_indices = @transform_1, window_bounds = array<i64: 256, 32>}, {pipeline_mode = #tpu.pipeline_mode<synchronous>, transform_indices = @transform_2, window_bounds = array<i64: 1, 32>}, {transform_indices = @transform_3, window_bounds = array<i64: 32, 32>}, {pipeline_mode = #tpu.pipeline_mode<synchronous>, transform_indices = @transform_4, window_bounds = array<i64: 1, 32>}, {pipeline_mode = #tpu.pipeline_mode<synchronous>, transform_indices = @transform_5, window_bounds = array<i64: 1, 32>}]} {
    %c0_i32 = arith.constant 0 : i32
    %0 = arith.cmpi eq, %arg0, %c0_i32 : i32
    %1 = arith.extui %0 : i1 to i32
    %c0_i32_0 = arith.constant 0 : i32
    %2 = arith.cmpi ne, %1, %c0_i32_0 : i32
    scf.if %2 {
      %cst_18 = arith.constant 0.000000e+00 : f32
      %21 = vector.broadcast %cst_18 : f32 to vector<1x32xf32>
      %c0_19 = arith.constant 0 : index
      %c0_20 = arith.constant 0 : index
      %22 = vector.load %arg5[%c0_19, %c0_20] : memref<1x32xf32, #tpu.memory_space<vmem>>, vector<1x32xf32>
      tpu.vector_store %arg5[%c0_19, %c0_20], %21 {strides = array<i32>} : memref<1x32xf32, #tpu.memory_space<vmem>>, vector<1x32xf32>,
      %cst_21 = arith.constant 0.000000e+00 : f32
      %23 = vector.broadcast %cst_21 : f32 to vector<1x32xf32>
      %c0_22 = arith.constant 0 : index
      %c0_23 = arith.constant 0 : index
      %24 = vector.load %arg6[%c0_22, %c0_23] : memref<1x32xf32, #tpu.memory_space<vmem>>, vector<1x32xf32>
      tpu.vector_store %arg6[%c0_22, %c0_23], %23 {strides = array<i32>} : memref<1x32xf32, #tpu.memory_space<vmem>>, vector<1x32xf32>,
    } else {
    }
    %c0 = arith.constant 0 : index
    %c0_1 = arith.constant 0 : index
    %3 = vector.load %arg1[%c0, %c0_1] : memref<32x256xf32, #tpu.memory_space<vmem>>, vector<32x256xf32>
    %c0_2 = arith.constant 0 : index
    %c0_3 = arith.constant 0 : index
    %4 = vector.load %arg2[%c0_2, %c0_3] : memref<256x32xf32, #tpu.memory_space<vmem>>, vector<256x32xf32>
    %cst = arith.constant dense<0.000000e+00> : vector<32x32xf32>
    %5 = tpu.matmul %3, %4, %cst {dimension_numbers = #tpu.dot_dimension_numbers<[1], [0], [0], [1], [0, 0, 1, 1], [], []>} : vector<32x256xf32>, vector<256x32xf32>, vector<32x32xf32> -> vector<32x32xf32>
    %c0_4 = arith.constant 0 : index
    %c0_5 = arith.constant 0 : index
    %6 = vector.load %arg3[%c0_4, %c0_5] : memref<1x32xf32, #tpu.memory_space<vmem>>, vector<1x32xf32>
    %7 = vector.broadcast %6 : vector<1x32xf32> to vector<32x32xf32>
    %8 = arith.addf %5, %7 : vector<32x32xf32>
    %c0_6 = arith.constant 0 : index
    %c0_7 = arith.constant 0 : index
    %9 = vector.load %arg4[%c0_6, %c0_7] : memref<32x32xf32, #tpu.memory_space<vmem>>, vector<32x32xf32>
    tpu.vector_store %arg4[%c0_6, %c0_7], %8 {strides = array<i32>} : memref<32x32xf32, #tpu.memory_space<vmem>>, vector<32x32xf32>,
    %c0_8 = arith.constant 0 : index
    %c0_9 = arith.constant 0 : index
    %10 = vector.load %arg5[%c0_8, %c0_9] : memref<1x32xf32, #tpu.memory_space<vmem>>, vector<1x32xf32>
    %cst_10 = arith.constant dense<0.000000e+00> : vector<32xf32>
    %11 = vector.multi_reduction <add>, %8, %cst_10 [0] : vector<32x32xf32> to vector<32xf32>
    %12 = vector.shape_cast %11 : vector<32xf32> to vector<1x32xf32>
    %13 = arith.addf %10, %12 : vector<1x32xf32>
    %c0_11 = arith.constant 0 : index
    %c0_12 = arith.constant 0 : index
    %14 = vector.load %arg5[%c0_11, %c0_12] : memref<1x32xf32, #tpu.memory_space<vmem>>, vector<1x32xf32>
    tpu.vector_store %arg5[%c0_11, %c0_12], %13 {strides = array<i32>} : memref<1x32xf32, #tpu.memory_space<vmem>>, vector<1x32xf32>,
    %c0_13 = arith.constant 0 : index
    %c0_14 = arith.constant 0 : index
    %15 = vector.load %arg6[%c0_13, %c0_14] : memref<1x32xf32, #tpu.memory_space<vmem>>, vector<1x32xf32>
    %16 = arith.mulf %8, %8 : vector<32x32xf32>
    %cst_15 = arith.constant dense<0.000000e+00> : vector<32xf32>
    %17 = vector.multi_reduction <add>, %16, %cst_15 [0] : vector<32x32xf32> to vector<32xf32>
    %18 = vector.shape_cast %17 : vector<32xf32> to vector<1x32xf32>
    %19 = arith.addf %15, %18 : vector<1x32xf32>
    %c0_16 = arith.constant 0 : index
    %c0_17 = arith.constant 0 : index
    %20 = vector.load %arg6[%c0_16, %c0_17] : memref<1x32xf32, #tpu.memory_space<vmem>>, vector<1x32xf32>
    tpu.vector_store %arg6[%c0_16, %c0_17], %19 {strides = array<i32>} : memref<1x32xf32, #tpu.memory_space<vmem>>, vector<1x32xf32>,
    return
  }
  func.func @transform_0(%arg0: i32) -> (i32, i32) {
    %c0_i32 = arith.constant 0 : i32
    %c0_i32_0 = arith.constant 0 : i32
    return %arg0, %c0_i32 : i32, i32
  }
  func.func @transform_1(%arg0: i32) -> (i32, i32) {
    %c0_i32 = arith.constant 0 : i32
    %c0_i32_0 = arith.constant 0 : i32
    %c0_i32_1 = arith.constant 0 : i32
    return %c0_i32, %c0_i32_0 : i32, i32
  }
  func.func @transform_2(%arg0: i32) -> (i32, i32) {
    %c0_i32 = arith.constant 0 : i32
    %c0_i32_0 = arith.constant 0 : i32
    %c0_i32_1 = arith.constant 0 : i32
    return %c0_i32, %c0_i32_0 : i32, i32
  }
  func.func @transform_3(%arg0: i32) -> (i32, i32) {
    %c0_i32 = arith.constant 0 : i32
    %c0_i32_0 = arith.constant 0 : i32
    return %arg0, %c0_i32 : i32, i32
  }
  func.func @transform_4(%arg0: i32) -> (i32, i32) {
    %c0_i32 = arith.constant 0 : i32
    %c0_i32_0 = arith.constant 0 : i32
    %c0_i32_1 = arith.constant 0 : i32
    return %c0_i32, %c0_i32_0 : i32, i32
  }
  func.func @transform_5(%arg0: i32) -> (i32, i32) {
    %c0_i32 = arith.constant 0 : i32
    %c0_i32_0 = arith.constant 0 : i32
    %c0_i32_1 = arith.constant 0 : i32
    return %c0_i32, %c0_i32_0 : i32, i32
  }
}

module attributes {stable_mosaic.version = 11 : i64} {
  func.func @_head_kernel(%arg0: i32, %arg1: memref<32x32xf32, #tpu.memory_space<vmem>>, %arg2: memref<1x32xf32, #tpu.memory_space<vmem>>, %arg3: memref<1x32xf32, #tpu.memory_space<vmem>>, %arg4: memref<16x32xf32, #tpu.memory_space<vmem>>, %arg5: memref<1x1xf32, #tpu.memory_space<vmem>>, %arg6: memref<2x1xf32, #tpu.memory_space<vmem>>) attributes {dimension_semantics = [#tpu.dimension_semantics<parallel>], iteration_bounds = array<i64: 1>, scalar_prefetch = 0 : i64, scratch_operands = 0 : i64, tpu.core_type = #tpu.core_type<tc>, window_params = [{transform_indices = @transform_0, window_bounds = array<i64: 32, 32>}, {pipeline_mode = #tpu.pipeline_mode<synchronous>, transform_indices = @transform_1, window_bounds = array<i64: 1, 32>}, {pipeline_mode = #tpu.pipeline_mode<synchronous>, transform_indices = @transform_2, window_bounds = array<i64: 1, 32>}, {pipeline_mode = #tpu.pipeline_mode<synchronous>, transform_indices = @transform_3, window_bounds = array<i64: 16, 32>}, {pipeline_mode = #tpu.pipeline_mode<synchronous>, transform_indices = @transform_4, window_bounds = array<i64: 1, 1>}, {transform_indices = @transform_5, window_bounds = array<i64: 2, 1>}]} {
    %c0 = arith.constant 0 : index
    %c0_0 = arith.constant 0 : index
    %0 = vector.load %arg1[%c0, %c0_0] : memref<32x32xf32, #tpu.memory_space<vmem>>, vector<32x32xf32>
    %c0_1 = arith.constant 0 : index
    %c0_2 = arith.constant 0 : index
    %1 = vector.load %arg2[%c0_1, %c0_2] : memref<1x32xf32, #tpu.memory_space<vmem>>, vector<1x32xf32>
    %2 = vector.broadcast %1 : vector<1x32xf32> to vector<32x32xf32>
    %3 = arith.mulf %0, %2 : vector<32x32xf32>
    %c0_3 = arith.constant 0 : index
    %c0_4 = arith.constant 0 : index
    %4 = vector.load %arg3[%c0_3, %c0_4] : memref<1x32xf32, #tpu.memory_space<vmem>>, vector<1x32xf32>
    %5 = vector.broadcast %4 : vector<1x32xf32> to vector<32x32xf32>
    %6 = arith.addf %3, %5 : vector<32x32xf32>
    %cst = arith.constant 2.000000e-01 : f32
    %7 = vector.broadcast %cst : f32 to vector<32x32xf32>
    %8 = arith.mulf %7, %6 : vector<32x32xf32>
    %9 = arith.maximumf %6, %8 : vector<32x32xf32>
    %10 = vector.shape_cast %9 : vector<32x32xf32> to vector<2x16x32xf32>
    %c0_5 = arith.constant 0 : index
    %c0_6 = arith.constant 0 : index
    %11 = vector.load %arg4[%c0_5, %c0_6] : memref<16x32xf32, #tpu.memory_space<vmem>>, vector<16x32xf32>
    %12 = vector.shape_cast %11 : vector<16x32xf32> to vector<1x16x32xf32>
    %13 = vector.broadcast %12 : vector<1x16x32xf32> to vector<2x16x32xf32>
    %14 = arith.mulf %10, %13 : vector<2x16x32xf32>
    %cst_7 = arith.constant dense<0.000000e+00> : vector<2x32xf32>
    %15 = vector.multi_reduction <add>, %14, %cst_7 [1] : vector<2x16x32xf32> to vector<2x32xf32>
    %cst_8 = arith.constant dense<0.000000e+00> : vector<2xf32>
    %16 = vector.multi_reduction <add>, %15, %cst_8 [1] : vector<2x32xf32> to vector<2xf32>
    %17 = vector.shape_cast %16 : vector<2xf32> to vector<2x1xf32>
    %c0_9 = arith.constant 0 : index
    %c0_10 = arith.constant 0 : index
    %18 = vector.load %arg5[%c0_9, %c0_10] : memref<1x1xf32, #tpu.memory_space<vmem>>, vector<1x1xf32>
    %19 = vector.broadcast %18 : vector<1x1xf32> to vector<2x1xf32>
    %20 = arith.addf %17, %19 : vector<2x1xf32>
    %cst_11 = arith.constant 0.000000e+00 : f32
    %21 = vector.broadcast %cst_11 : f32 to vector<2x1xf32>
    %22 = arith.subf %21, %20 : vector<2x1xf32>
    %23 = math.exp %22 : vector<2x1xf32>
    %cst_12 = arith.constant 1.000000e+00 : f32
    %24 = vector.broadcast %cst_12 : f32 to vector<2x1xf32>
    %25 = arith.addf %24, %23 : vector<2x1xf32>
    %cst_13 = arith.constant 1.000000e+00 : f32
    %26 = vector.broadcast %cst_13 : f32 to vector<2x1xf32>
    %27 = arith.divf %26, %25 : vector<2x1xf32>
    %c0_14 = arith.constant 0 : index
    %c0_15 = arith.constant 0 : index
    %28 = vector.load %arg6[%c0_14, %c0_15] : memref<2x1xf32, #tpu.memory_space<vmem>>, vector<2x1xf32>
    tpu.vector_store %arg6[%c0_14, %c0_15], %27 {strides = array<i32>} : memref<2x1xf32, #tpu.memory_space<vmem>>, vector<2x1xf32>,
    return
  }
  func.func @transform_0(%arg0: i32) -> (i32, i32) {
    %c0_i32 = arith.constant 0 : i32
    %c0_i32_0 = arith.constant 0 : i32
    return %arg0, %c0_i32 : i32, i32
  }
  func.func @transform_1(%arg0: i32) -> (i32, i32) {
    %c0_i32 = arith.constant 0 : i32
    %c0_i32_0 = arith.constant 0 : i32
    %c0_i32_1 = arith.constant 0 : i32
    return %c0_i32, %c0_i32_0 : i32, i32
  }
  func.func @transform_2(%arg0: i32) -> (i32, i32) {
    %c0_i32 = arith.constant 0 : i32
    %c0_i32_0 = arith.constant 0 : i32
    %c0_i32_1 = arith.constant 0 : i32
    return %c0_i32, %c0_i32_0 : i32, i32
  }
  func.func @transform_3(%arg0: i32) -> (i32, i32) {
    %c0_i32 = arith.constant 0 : i32
    %c0_i32_0 = arith.constant 0 : i32
    %c0_i32_1 = arith.constant 0 : i32
    return %c0_i32, %c0_i32_0 : i32, i32
  }
  func.func @transform_4(%arg0: i32) -> (i32, i32) {
    %c0_i32 = arith.constant 0 : i32
    %c0_i32_0 = arith.constant 0 : i32
    %c0_i32_1 = arith.constant 0 : i32
    return %c0_i32, %c0_i32_0 : i32, i32
  }
  func.func @transform_5(%arg0: i32) -> (i32, i32) {
    %c0_i32 = arith.constant 0 : i32
    %c0_i32_0 = arith.constant 0 : i32
    return %arg0, %c0_i32 : i32, i32
  }
}

</mosaic_0001>

<bundles_post_ra>
// kernel: discriminator_forward.5
= control target key start
LH: loop header
LB: loop body
LE: loop exit
PB: predicated region body
PF: predicated region fallthrough
CT: control target
= control target key end

     0   :  { %s890_s12 = smov 0   ;;  %s1101_s0 = inlined_call_operand.vmem [shape: f32[512,48], index: 0, kind: input, shape index: {}]   ;;  %s1102_s1 = inlined_call_operand.vmem [shape: f32[48,8], index: 1, kind: input, shape index: {}]   ;;  %s1103_s2 = inlined_call_operand.vmem [shape: f32[1,8], index: 2, kind: input, shape index: {}]   ;;  %s1104_s3 = inlined_call_operand.vmem [shape: f32[512,8], index: 3, kind: output, shape index: {}]  }
   0x1 LB: > { %s694_s13 = sadd.s32 4294967295, %s868_s12   ;;  %p698_p0 = scmp.ge.s32.totalorder %s868_s12, 1  ;;  %s868_s12 = sphi %s890_s12, %s13_s12  }
   0x2   : > { %p138_p1 = scmp.lt.s32.totalorder %s868_s12, 3 }
   0x4   : > { %p139_p2 = pnand %p698_p0, %p138_p1 }
   0x5   : > { %v206_v0 = vld [vmem:[%s1102_s1] sm:$0xff] (!%p139_p2)  ;;  %v207_v1 = vld [vmem:[%s1102_s1 + $0x8] sm:$0xff] (!%p139_p2)  ;;  %v208_v2 = vld [vmem:[%s1102_s1 + $0x10] sm:$0xff] (!%p139_p2)  ;;  %s699_s20 = sshll.u32 (!%p139_p2), %s694_s13, 5  ;;  %vm219_vm0 = vcmask (!%p139_p2), 392192   ;;  %vm605_vm1 = vcmask (!%p139_p2), 64512  }
   0x6   : > { %142 = sbr.rel (%p139_p2) target bundleno = 270 (0x10e), region = 32  ;;  %v836_v3 = vpack.c.bf16 (!%p139_p2), %v207_v1, %v206_v0  ;;  %v209_v4 = vld [vmem:[%s1102_s1 + $0x18] sm:$0xff] (!%p139_p2)  ;;  %p163_p3 = scmp.lt.s32.totalorder (!%p139_p2), %s699_s20, 63  ;;  %v210_v6 = vld [vmem:[%s1102_s1 + $0x20] sm:$0xff] (!%p139_p2)  ;;  %v211_v7 = vld [vmem:[%s1102_s1 + $0x28] sm:$0xff] (!%p139_p2) }
   0x7   : > { %v840_v5 = vpack.c.bf16 (!%p139_p2), %v209_v4, %v208_v2  ;;  %v844_v8 = vpack.c.bf16 (!%p139_p2), %v211_v7, %v210_v6  ;;  %v993_v41 = vld [vmem:[%s1103_s2] ss:$0 sm:$0xff] (!%p139_p2) }
   0x8   : > { %837 = vmatprep.subr.bf16.mxu0 (!%p139_p2), %v836_v3  ;;  %848 = vmatprep.subr.bf16.mxu1 (!%p139_p2), %v836_v3 }
   0x9   : > { %839 = vmatpush3.bf16.msra.mxu0 (!%p139_p2), %v836_v3  ;;  %851 = vmatpush3.bf16.msra.mxu1 (!%p139_p2), %v836_v3 }
   0xa   : > { %841 = vmatprep.subr.bf16.mxu0 (!%p139_p2), %v840_v5  ;;  %849 = vmatprep.subr.bf16.mxu1 (!%p139_p2), %v840_v5 }
   0xd   : > { %s1106_s20 = smov (!%p163_p3, %s699_s20), 63  ;;  %843 = vmatpush3.bf16.msra.mxu0 %v840_v5  ;;  %852 = vmatpush3.bf16.msra.mxu1 %v840_v5 }
   0xe   : > { %s700_s27 = sshll.u32 %s1106_s20, 3  ;;  %845 = vmatprep.subr.bf16.mxu0 %v844_v8  ;;  %850 = vmatprep.subr.bf16.mxu1 %v844_v8 }
   0xf   : > { %s924_s30 = scalar_lea.vmem %s1101_s0, %s700_s27  ;;  %s1004_s8 = scalar_lea.vmem %s1104_s3, %s700_s27 }
  0x10   : > { %v174_v9 = vld [vmem:[%s924_s30] sm:$0xff]  ;;  %v175_v11 = vld [vmem:[%s924_s30 + $0x8] sm:$0xff]  ;;  %v176_v13 = vld [vmem:[%s924_s30 + $0x10] sm:$0xff] }
  0x11   : > { %v190_v10 = vld [vmem:[%s924_s30 + $0x80] sm:$0xff]  ;;  %788 = vmatprep.mubr.msk.f32.mxu0 %vm219_vm0, %v174_v9  ;;  %847 = vmatpush3.bf16.msra.mxu0 %v844_v8  ;;  %v191_v12 = vld [vmem:[%s924_s30 + $0x88] sm:$0xff]  ;;  %v192_v14 = vld [vmem:[%s924_s30 + $0x90] sm:$0xff] }
  0x12   : > { %812 = vmatprep.mubr.msk.f32.mxu1 %vm219_vm0, %v190_v10  ;;  %853 = vmatpush3.bf16.msra.mxu1 %v844_v8  ;;  %v177_v15 = vld [vmem:[%s924_s30 + $0x18] sm:$0xff]  ;;  %v178_v17 = vld [vmem:[%s924_s30 + $0x20] sm:$0xff]  ;;  %v179_v19 = vld [vmem:[%s924_s30 + $0x28] sm:$0xff] }
  0x13   : > { %v193_v16 = vld [vmem:[%s924_s30 + $0x98] sm:$0xff]  ;;  %v194_v18 = vld [vmem:[%s924_s30 + $0xa0] sm:$0xff]  ;;  %v195_v20 = vld [vmem:[%s924_s30 + $0xa8] sm:$0xff] }
  0x14   : > { %789 = vmatmul.mubr.msk.f32.vlgmr.msra.gmra.mrb[0].mxu0 %vm219_vm0, %v175_v11  ;;  %v180_v21 = vld [vmem:[%s924_s30 + $0x30] sm:$0xff]  ;;  %v181_v23 = vld [vmem:[%s924_s30 + $0x38] sm:$0xff]  ;;  %v182_v25 = vld [vmem:[%s924_s30 + $0x40] sm:$0xff] }
  0x15   : > { %813 = vmatmul.mubr.msk.f32.vlgmr.msra.gmra.mrb[0].mxu1 %vm219_vm0, %v191_v12  ;;  %791 = vmatprep.mubr.msk.f32.mxu0 %vm219_vm0, %v176_v13  ;;  %v196_v22 = vld [vmem:[%s924_s30 + $0xb0] sm:$0xff]  ;;  %v197_v24 = vld [vmem:[%s924_s30 + $0xb8] sm:$0xff]  ;;  %v198_v26 = vld [vmem:[%s924_s30 + $0xc0] sm:$0xff] }
  0x16   : > { %815 = vmatprep.mubr.msk.f32.mxu1 %vm219_vm0, %v192_v14  ;;  %v183_v27 = vld [vmem:[%s924_s30 + $0x48] sm:$0xff]  ;;  %v184_v29 = vld [vmem:[%s924_s30 + $0x50] sm:$0xff]  ;;  %v185_v31 = vld [vmem:[%s924_s30 + $0x58] sm:$0xff] }
  0x17   : > { %v199_v28 = vld [vmem:[%s924_s30 + $0xc8] sm:$0xff]  ;;  %v200_v30 = vld [vmem:[%s924_s30 + $0xd0] sm:$0xff]  ;;  %v201_v32 = vld [vmem:[%s924_s30 + $0xd8] sm:$0xff] }
  0x18   : > { %792 = vmatmul.mubr.msk.f32.gmra.mrb[2].mxu0 %vm219_vm0, %v177_v15  ;;  %v186_v33 = vld [vmem:[%s924_s30 + $0x60] sm:$0xff]  ;;  %v187_v35 = vld [vmem:[%s924_s30 + $0x68] sm:$0xff]  ;;  %v188_v37 = vld [vmem:[%s924_s30 + $0x70] sm:$0xff] }
  0x19   : > { %816 = vmatmul.mubr.msk.f32.gmra.mrb[2].mxu1 %vm219_vm0, %v193_v16  ;;  %794 = vmatprep.mubr.msk.f32.mxu0 %vm219_vm0, %v178_v17  ;;  %v202_v34 = vld [vmem:[%s924_s30 + $0xe0] sm:$0xff]  ;;  %v203_v36 = vld [vmem:[%s924_s30 + $0xe8] sm:$0xff]  ;;  %v204_v38 = vld [vmem:[%s924_s30 + $0xf0] sm:$0xff] }
  0x1a   : > { %818 = vmatprep.mubr.msk.f32.mxu1 %vm219_vm0, %v194_v18  ;;  %v189_v39 = vld [vmem:[%s924_s30 + $0x78] sm:$0xff] }
  0x1b   : > { %v205_v40 = vld [vmem:[%s924_s30 + $0xf8] sm:$0xff] }
  0x1c   : > { %795 = vmatmul.mubr.msk.f32.gmra.mrb[4].mxu0 %vm219_vm0, %v179_v19 }
  0x1d   : > { %819 = vmatmul.mubr.msk.f32.gmra.mrb[4].mxu1 %vm219_vm0, %v195_v20  ;;  %797 = vmatprep.mubr.msk.f32.mxu0 %vm219_vm0, %v180_v21 }
  0x1e   : > { %821 = vmatprep.mubr.msk.f32.mxu1 %vm219_vm0, %v196_v22 }
  0x20   : > { %798 = vmatmul.mubr.msk.f32.gmra.mrb[6].mxu0 %vm219_vm0, %v181_v23 }
  0x21   : > { %822 = vmatmul.mubr.msk.f32.gmra.mrb[6].mxu1 %vm219_vm0, %v197_v24  ;;  %800 = vmatprep.mubr.msk.f32.mxu0 %vm219_vm0, %v182_v25 }
  0x22   : > { %824 = vmatprep.mubr.msk.f32.mxu1 %vm219_vm0, %v198_v26 }
  0x24   : > { %801 = vmatmul.mubr.msk.f32.gmra.mrb[8].mxu0 %vm219_vm0, %v183_v27 }
  0x25   : > { %825 = vmatmul.mubr.msk.f32.gmra.mrb[8].mxu1 %vm219_vm0, %v199_v28  ;;  %803 = vmatprep.mubr.msk.f32.mxu0 %vm219_vm0, %v184_v29 }
  0x26   : > { %827 = vmatprep.mubr.msk.f32.mxu1 %vm219_vm0, %v200_v30 }
  0x28   : > { %804 = vmatmul.mubr.msk.f32.gmra.mrb[10].mxu0 %vm219_vm0, %v185_v31 }
  0x29   : > { %828 = vmatmul.mubr.msk.f32.gmra.mrb[10].mxu1 %vm219_vm0, %v201_v32  ;;  %806 = vmatprep.mubr.msk.f32.mxu0 %vm219_vm0, %v186_v33 }
  0x2a   : > { %830 = vmatprep.mubr.msk.f32.mxu1 %vm219_vm0, %v202_v34 }
  0x2c   : > { %807 = vmatmul.mubr.msk.f32.gmra.mrb[12].mxu0 %vm219_vm0, %v187_v35 }
  0x2d   : > { %831 = vmatmul.mubr.msk.f32.gmra.mrb[12].mxu1 %vm219_vm0, %v203_v36  ;;  %809 = vmatprep.mubr.msk.f32.mxu0 %vm219_vm0, %v188_v37 }
  0x2e   : > { %833 = vmatprep.mubr.msk.f32.mxu1 %vm219_vm0, %v204_v38 }
  0x30   : > { %810 = vmatmul.mubr.msk.f32.gmra.mrb[14].mxu0 %vm219_vm0, %v189_v39 }
  0x31   : > { %834 = vmatmul.mubr.msk.f32.gmra.mrb[14].mxu1 %vm219_vm0, %v205_v40 }
  0xe7   : > { %v790_v42 = vpop.f32.mrb[0].mxu0 }
  0xe8   : > { %v814_v43 = vpop.f32.mrb[0].mxu1  ;;  %v388_v44 = vadd.f32 %v790_v42, %v993_v41  ;;  %v382_v46 = vpop.f32.mrb[1].mxu0 }
  0xe9   : > { %v468_v45 = vadd.f32 %v814_v43, %v993_v41  ;;  %v462_v47 = vpop.f32.mrb[1].mxu1  ;;  %v383_v48 = vadd.f32 %v993_v41, %v382_v46 }
  0xea   : > { %v463_v49 = vadd.f32 %v993_v41, %v462_v47  ;;  %v542_v50 = vmul.f32 0.2, %v388_v44 }
  0xeb   : > { %v558_v51 = vmul.f32 0.2, %v468_v45  ;;  %v541_v52 = vmul.f32 0.2, %v383_v48  ;;  %v793_v54 = vpop.f32.mrb[2].mxu0 }
  0xec   : > { %v557_v53 = vmul.f32 0.2, %v463_v49  ;;  %v817_v55 = vpop.f32.mrb[2].mxu1  ;;  %v574_v56 = vmax.f32 %v388_v44, %v542_v50  ;;  %v398_v58 = vadd.f32 %v793_v54, %v993_v41  ;;  %v392_v60 = vpop.f32.mrb[3].mxu0 }
  0xed   : > { %v590_v57 = vmax.f32 %v468_v45, %v558_v51  ;;  %v478_v59 = vadd.f32 %v817_v55, %v993_v41  ;;  %v472_v61 = vpop.f32.mrb[3].mxu1  ;;  %v573_v62 = vmax.f32 %v383_v48, %v541_v52  ;;  %v393_v0 = vadd.f32 %v993_v41, %v392_v60 }
  0xee   : > { %v589_v63 = vmax.f32 %v463_v49, %v557_v53  ;;  %v473_v1 = vadd.f32 %v993_v41, %v472_v61  ;;  %607 = vst.msk [vmem:[%s1004_s8 + $0x8] sm:$0xff] %vm605_vm1, %v574_v56  ;;  %v544_v2 = vmul.f32 0.2, %v398_v58 }
  0xef   : > { %623 = vst.msk [vmem:[%s1004_s8 + $0x88] sm:$0xff] %vm605_vm1, %v590_v57  ;;  %v560_v3 = vmul.f32 0.2, %v478_v59  ;;  %606 = vst.msk [vmem:[%s1004_s8] sm:$0xff] %vm605_vm1, %v573_v62  ;;  %v543_v4 = vmul.f32 0.2, %v393_v0 }
  0xf0   : > { %622 = vst.msk [vmem:[%s1004_s8 + $0x80] sm:$0xff] %vm605_vm1, %v589_v63  ;;  %v559_v5 = vmul.f32 0.2, %v473_v1  ;;  %v796_v6 = vpop.f32.mrb[4].mxu0  ;;  %v820_v7 = vpop.f32.mrb[4].mxu1  ;;  %v576_v8 = vmax.f32 %v398_v58, %v544_v2 }
  0xf1   : > { %v592_v9 = vmax.f32 %v478_v59, %v560_v3  ;;  %v408_v10 = vadd.f32 %v796_v6, %v993_v41  ;;  %v488_v11 = vadd.f32 %v820_v7, %v993_v41  ;;  %v402_v12 = vpop.f32.mrb[5].mxu0  ;;  %v482_v13 = vpop.f32.mrb[5].mxu1  ;;  %v575_v14 = vmax.f32 %v393_v0, %v543_v4 }
  0xf2   : > { %v591_v15 = vmax.f32 %v473_v1, %v559_v5  ;;  %v403_v16 = vadd.f32 %v993_v41, %v402_v12  ;;  %v483_v17 = vadd.f32 %v993_v41, %v482_v13  ;;  %609 = vst.msk [vmem:[%s1004_s8 + $0x18] sm:$0xff] %vm605_vm1, %v576_v8 }
  0xf3   : > { %625 = vst.msk [vmem:[%s1004_s8 + $0x98] sm:$0xff] %vm605_vm1, %v592_v9  ;;  %v546_v18 = vmul.f32 0.2, %v408_v10  ;;  %v562_v19 = vmul.f32 0.2, %v488_v11  ;;  %608 = vst.msk [vmem:[%s1004_s8 + $0x10] sm:$0xff] %vm605_vm1, %v575_v14 }
  0xf4   : > { %624 = vst.msk [vmem:[%s1004_s8 + $0x90] sm:$0xff] %vm605_vm1, %v591_v15  ;;  %v545_v20 = vmul.f32 0.2, %v403_v16  ;;  %v561_v21 = vmul.f32 0.2, %v483_v17  ;;  %v799_v22 = vpop.f32.mrb[6].mxu0 }
  0xf5   : > { %v823_v23 = vpop.f32.mrb[6].mxu1  ;;  %v578_v24 = vmax.f32 %v408_v10, %v546_v18  ;;  %v594_v25 = vmax.f32 %v488_v11, %v562_v19  ;;  %v418_v26 = vadd.f32 %v799_v22, %v993_v41  ;;  %v412_v28 = vpop.f32.mrb[7].mxu0 }
  0xf6   : > { %v498_v27 = vadd.f32 %v823_v23, %v993_v41  ;;  %v492_v29 = vpop.f32.mrb[7].mxu1  ;;  %v577_v30 = vmax.f32 %v403_v16, %v545_v20  ;;  %v593_v31 = vmax.f32 %v483_v17, %v561_v21  ;;  %v413_v32 = vadd.f32 %v993_v41, %v412_v28 }
  0xf7   : > { %v493_v33 = vadd.f32 %v993_v41, %v492_v29  ;;  %611 = vst.msk [vmem:[%s1004_s8 + $0x28] sm:$0xff] %vm605_vm1, %v578_v24  ;;  %627 = vst.msk [vmem:[%s1004_s8 + $0xa8] sm:$0xff] %vm605_vm1, %v594_v25  ;;  %v548_v34 = vmul.f32 0.2, %v418_v26  ;;  %v802_v38 = vpop.f32.mrb[8].mxu0 }
  0xf8   : > { %v564_v35 = vmul.f32 0.2, %v498_v27  ;;  %610 = vst.msk [vmem:[%s1004_s8 + $0x20] sm:$0xff] %vm605_vm1, %v577_v30  ;;  %626 = vst.msk [vmem:[%s1004_s8 + $0xa0] sm:$0xff] %vm605_vm1, %v593_v31  ;;  %v547_v36 = vmul.f32 0.2, %v413_v32  ;;  %v428_v43 = vadd.f32 %v802_v38, %v993_v41 }
  0xf9   : > { %v563_v37 = vmul.f32 0.2, %v493_v33  ;;  %v826_v39 = vpop.f32.mrb[8].mxu1  ;;  %v580_v40 = vmax.f32 %v418_v26, %v548_v34  ;;  %v422_v45 = vpop.f32.mrb[9].mxu0 }
  0xfa   : > { %v596_v42 = vmax.f32 %v498_v27, %v564_v35  ;;  %v508_v44 = vadd.f32 %v826_v39, %v993_v41  ;;  %v502_v46 = vpop.f32.mrb[9].mxu1  ;;  %v579_v47 = vmax.f32 %v413_v32, %v547_v36  ;;  %v423_v49 = vadd.f32 %v993_v41, %v422_v45 }
  0xfb   : > { %v595_v48 = vmax.f32 %v493_v33, %v563_v37  ;;  %v503_v50 = vadd.f32 %v993_v41, %v502_v46  ;;  %613 = vst.msk [vmem:[%s1004_s8 + $0x38] sm:$0xff] %vm605_vm1, %v580_v40  ;;  %v550_v51 = vmul.f32 0.2, %v428_v43  ;;  %v805_v55 = vpop.f32.mrb[10].mxu0 }
  0xfc   : > { %629 = vst.msk [vmem:[%s1004_s8 + $0xb8] sm:$0xff] %vm605_vm1, %v596_v42  ;;  %v566_v52 = vmul.f32 0.2, %v508_v44  ;;  %612 = vst.msk [vmem:[%s1004_s8 + $0x30] sm:$0xff] %vm605_vm1, %v579_v47  ;;  %v549_v53 = vmul.f32 0.2, %v423_v49  ;;  %v438_v59 = vadd.f32 %v805_v55, %v993_v41 }
  0xfd   : > { %628 = vst.msk [vmem:[%s1004_s8 + $0xb0] sm:$0xff] %vm605_vm1, %v595_v48  ;;  %v565_v54 = vmul.f32 0.2, %v503_v50  ;;  %v829_v56 = vpop.f32.mrb[10].mxu1  ;;  %v582_v57 = vmax.f32 %v428_v43, %v550_v51  ;;  %v432_v61 = vpop.f32.mrb[11].mxu0 }
  0xfe   : > { %v598_v58 = vmax.f32 %v508_v44, %v566_v52  ;;  %v518_v60 = vadd.f32 %v829_v56, %v993_v41  ;;  %v512_v62 = vpop.f32.mrb[11].mxu1  ;;  %v581_v63 = vmax.f32 %v423_v49, %v549_v53  ;;  %v433_v1 = vadd.f32 %v993_v41, %v432_v61 }
  0xff   : > { %v597_v0 = vmax.f32 %v503_v50, %v565_v54  ;;  %v513_v2 = vadd.f32 %v993_v41, %v512_v62  ;;  %615 = vst.msk [vmem:[%s1004_s8 + $0x48] sm:$0xff] %vm605_vm1, %v582_v57  ;;  %v552_v3 = vmul.f32 0.2, %v438_v59  ;;  %v808_v7 = vpop.f32.mrb[12].mxu0 }
 0x100   : > { %631 = vst.msk [vmem:[%s1004_s8 + $0xc8] sm:$0xff] %vm605_vm1, %v598_v58  ;;  %v568_v4 = vmul.f32 0.2, %v518_v60  ;;  %614 = vst.msk [vmem:[%s1004_s8 + $0x40] sm:$0xff] %vm605_vm1, %v581_v63  ;;  %v551_v5 = vmul.f32 0.2, %v433_v1  ;;  %v448_v11 = vadd.f32 %v808_v7, %v993_v41 }
 0x101   : > { %630 = vst.msk [vmem:[%s1004_s8 + $0xc0] sm:$0xff] %vm605_vm1, %v597_v0  ;;  %v567_v6 = vmul.f32 0.2, %v513_v2  ;;  %v832_v8 = vpop.f32.mrb[12].mxu1  ;;  %v584_v9 = vmax.f32 %v438_v59, %v552_v3  ;;  %v442_v13 = vpop.f32.mrb[13].mxu0 }
 0x102   : > { %v600_v10 = vmax.f32 %v518_v60, %v568_v4  ;;  %v528_v12 = vadd.f32 %v832_v8, %v993_v41  ;;  %v522_v14 = vpop.f32.mrb[13].mxu1  ;;  %v583_v15 = vmax.f32 %v433_v1, %v551_v5  ;;  %v443_v17 = vadd.f32 %v993_v41, %v442_v13 }
 0x103   : > { %v599_v16 = vmax.f32 %v513_v2, %v567_v6  ;;  %v523_v18 = vadd.f32 %v993_v41, %v522_v14  ;;  %617 = vst.msk [vmem:[%s1004_s8 + $0x58] sm:$0xff] %vm605_vm1, %v584_v9  ;;  %v554_v19 = vmul.f32 0.2, %v448_v11  ;;  %v811_v23 = vpop.f32.mrb[14].mxu0 }
 0x104   : > { %633 = vst.msk [vmem:[%s1004_s8 + $0xd8] sm:$0xff] %vm605_vm1, %v600_v10  ;;  %v570_v20 = vmul.f32 0.2, %v528_v12  ;;  %616 = vst.msk [vmem:[%s1004_s8 + $0x50] sm:$0xff] %vm605_vm1, %v583_v15  ;;  %v553_v21 = vmul.f32 0.2, %v443_v17  ;;  %v458_v27 = vadd.f32 %v811_v23, %v993_v41 }
 0x105   : > { %632 = vst.msk [vmem:[%s1004_s8 + $0xd0] sm:$0xff] %vm605_vm1, %v599_v16  ;;  %v569_v22 = vmul.f32 0.2, %v523_v18  ;;  %v835_v24 = vpop.f32.mrb[14].mxu1  ;;  %v586_v25 = vmax.f32 %v448_v11, %v554_v19  ;;  %v452_v29 = vpop.f32.mrb[15].mxu0 }
 0x106   : > { %v602_v26 = vmax.f32 %v528_v12, %v570_v20  ;;  %v538_v28 = vadd.f32 %v835_v24, %v993_v41  ;;  %v532_v30 = vpop.f32.mrb[15].mxu1  ;;  %v585_v31 = vmax.f32 %v443_v17, %v553_v21  ;;  %v453_v33 = vadd.f32 %v993_v41, %v452_v29 }
 0x107   : > { %v601_v32 = vmax.f32 %v523_v18, %v569_v22  ;;  %v533_v34 = vadd.f32 %v993_v41, %v532_v30  ;;  %619 = vst.msk [vmem:[%s1004_s8 + $0x68] sm:$0xff] %vm605_vm1, %v586_v25  ;;  %v556_v35 = vmul.f32 0.2, %v458_v27 }
 0x108   : > { %635 = vst.msk [vmem:[%s1004_s8 + $0xe8] sm:$0xff] %vm605_vm1, %v602_v26  ;;  %v572_v36 = vmul.f32 0.2, %v538_v28  ;;  %618 = vst.msk [vmem:[%s1004_s8 + $0x60] sm:$0xff] %vm605_vm1, %v585_v31  ;;  %v555_v37 = vmul.f32 0.2, %v453_v33 }
 0x109   : > { %634 = vst.msk [vmem:[%s1004_s8 + $0xe0] sm:$0xff] %vm605_vm1, %v601_v32  ;;  %v571_v38 = vmul.f32 0.2, %v533_v34  ;;  %v588_v39 = vmax.f32 %v458_v27, %v556_v35 }
 0x10a   : > { %v604_v40 = vmax.f32 %v538_v28, %v572_v36  ;;  %v587_v42 = vmax.f32 %v453_v33, %v555_v37 }
 0x10b   : > { %v603_v43 = vmax.f32 %v533_v34, %v571_v38  ;;  %621 = vst.msk [vmem:[%s1004_s8 + $0x78] sm:$0xff] %vm605_vm1, %v588_v39 }
 0x10c   : > { %637 = vst.msk [vmem:[%s1004_s8 + $0xf8] sm:$0xff] %vm605_vm1, %v604_v40  ;;  %620 = vst.msk [vmem:[%s1004_s8 + $0x70] sm:$0xff] %vm605_vm1, %v587_v42 }
 0x10d   : > { %636 = vst.msk [vmem:[%s1004_s8 + $0xf0] sm:$0xff] %vm605_vm1, %v603_v43 }
 0x10e PF: > { %s13_s12 = sadd.s32 1, %s868_s12  }
 0x10f   : > { %p10_p4 = scmp.ge.s32.totalorder %s13_s12, 4  }
 0x111   :  { %12 = sbr.rel (!%p10_p4) target bundleno = 1 (0x1), region = 62 }

// kernel: discriminator_forward.6
= control target key start
LH: loop header
LB: loop body
LE: loop exit
PB: predicated region body
PF: predicated region fallthrough
CT: control target
= control target key end

     0   :  { %vm21_vm0 = vcmask 122880   ;;  %v472_v40 = vmov 0.0   ;;  %vm208_vm1 = vcmask 130048   ;;  %s762_s1 = inlined_call_operand.vmem [shape: f32[128,16], index: 1, kind: input, shape index: {}]   ;;  %s763_s0 = inlined_call_operand.vmem [shape: f32[128,128], index: 0, kind: input, shape index: {}]   ;;  %s764_s4 = inlined_call_operand.vmem [shape: f32[1,16], index: 4, kind: output, shape index: {1}]   ;;  %s765_s5 = inlined_call_operand.vmem [shape: f32[1,16], index: 5, kind: output, shape index: {2}]   ;;  %s766_s2 = inlined_call_operand.vmem [shape: f32[1,16], index: 2, kind: input, shape index: {}]   ;;  %s767_s3 = inlined_call_operand.vmem [shape: f32[128,16], index: 3, kind: output, shape index: {0}]  }
   0x1   :  { %v40_v0 = vld [vmem:[%s762_s1] sm:$0xff]  ;;  %v41_v1 = vld [vmem:[%s762_s1 + $0x8] sm:$0xff]  ;;  %v42_v2 = vld [vmem:[%s762_s1 + $0x10] sm:$0xff]  ;;  %22 = vst.msk [vmem:[%s764_s4] sm:$0x1] %vm21_vm0, %v472_v40 }
   0x2   :  { %v423_v3 = vpack.c.bf16 %v41_v1, %v40_v0  ;;  %v43_v4 = vld [vmem:[%s762_s1 + $0x18] sm:$0xff]  ;;  %v44_v6 = vld [vmem:[%s762_s1 + $0x20] sm:$0xff]  ;;  %v45_v7 = vld [vmem:[%s762_s1 + $0x28] sm:$0xff]  ;;  %23 = vst.msk [vmem:[%s765_s5] sm:$0x1] %vm21_vm0, %v472_v40 }
   0x3   :  { %v427_v5 = vpack.c.bf16 %v43_v4, %v42_v2  ;;  %v431_v8 = vpack.c.bf16 %v45_v7, %v44_v6  ;;  %v24_v9 = vld [vmem:[%s763_s0] sm:$0xff]  ;;  %v46_v10 = vld [vmem:[%s762_s1 + $0x30] sm:$0xff]  ;;  %v47_v11 = vld [vmem:[%s762_s1 + $0x38] sm:$0xff] }
   0x4   :  { %424 = vmatprep.subr.bf16.mxu0 %v423_v3  ;;  %455 = vmatprep.subr.bf16.mxu1 %v423_v3  ;;  %v32_v12 = vld [vmem:[%s763_s0 + $0x40] sm:$0xff]  ;;  %v435_v13 = vpack.c.bf16 %v47_v11, %v46_v10  ;;  %v49_v15 = vld [vmem:[%s762_s1 + $0x48] sm:$0xff]  ;;  %v50_v17 = vld [vmem:[%s762_s1 + $0x50] sm:$0xff] }
   0x5   :  { %426 = vmatpush3.bf16.msra.mxu0 %v423_v3  ;;  %463 = vmatpush3.bf16.msra.mxu1 %v423_v3  ;;  %v48_v14 = vld [vmem:[%s762_s1 + $0x40] sm:$0xff]  ;;  %v51_v18 = vld [vmem:[%s762_s1 + $0x58] sm:$0xff]  ;;  %v53_v21 = vld [vmem:[%s762_s1 + $0x68] sm:$0xff] }
   0x6   :  { %428 = vmatprep.subr.bf16.mxu0 %v427_v5  ;;  %456 = vmatprep.subr.bf16.mxu1 %v427_v5  ;;  %v439_v16 = vpack.c.bf16 %v49_v15, %v48_v14  ;;  %v443_v19 = vpack.c.bf16 %v51_v18, %v50_v17  ;;  %v52_v20 = vld [vmem:[%s762_s1 + $0x60] sm:$0xff]  ;;  %v54_v23 = vld [vmem:[%s762_s1 + $0x70] sm:$0xff]  ;;  %v55_v24 = vld [vmem:[%s762_s1 + $0x78] sm:$0xff] }
   0x7   :  { %399 = vmatprep.mubr.f32.mxu0 %v24_v9  ;;  %411 = vmatprep.mubr.f32.mxu1 %v32_v12  ;;  %v447_v22 = vpack.c.bf16 %v53_v21, %v52_v20  ;;  %v451_v25 = vpack.c.bf16 %v55_v24, %v54_v23  ;;  %v25_v26 = vld [vmem:[%s763_s0 + $0x8] sm:$0xff]  ;;  %v26_v28 = vld [vmem:[%s763_s0 + $0x10] sm:$0xff]  ;;  %v27_v30 = vld [vmem:[%s763_s0 + $0x18] sm:$0xff] }
   0x8   :  { %v33_v27 = vld [vmem:[%s763_s0 + $0x48] sm:$0xff]  ;;  %v34_v29 = vld [vmem:[%s763_s0 + $0x50] sm:$0xff]  ;;  %v35_v31 = vld [vmem:[%s763_s0 + $0x58] sm:$0xff] }
   0x9   :  { %430 = vmatpush3.bf16.msra.mxu0 %v427_v5  ;;  %464 = vmatpush3.bf16.msra.mxu1 %v427_v5  ;;  %v28_v32 = vld [vmem:[%s763_s0 + $0x20] sm:$0xff]  ;;  %v29_v34 = vld [vmem:[%s763_s0 + $0x28] sm:$0xff]  ;;  %v30_v36 = vld [vmem:[%s763_s0 + $0x30] sm:$0xff] }
   0xa   :  { %432 = vmatprep.subr.bf16.mxu0 %v431_v8  ;;  %457 = vmatprep.subr.bf16.mxu1 %v431_v8  ;;  %v36_v33 = vld [vmem:[%s763_s0 + $0x60] sm:$0xff]  ;;  %v37_v35 = vld [vmem:[%s763_s0 + $0x68] sm:$0xff]  ;;  %v38_v37 = vld [vmem:[%s763_s0 + $0x70] sm:$0xff] }
   0xb   :  { %v31_v38 = vld [vmem:[%s763_s0 + $0x38] sm:$0xff]  ;;  %v610_v41 = vld [vmem:[%s766_s2] ss:$0 sm:$0xff] }
   0xc   :  { %v39_v39 = vld [vmem:[%s763_s0 + $0x78] sm:$0xff] }
   0xd   :  { %434 = vmatpush3.bf16.msra.mxu0 %v431_v8  ;;  %465 = vmatpush3.bf16.msra.mxu1 %v431_v8 }
   0xe   :  { %436 = vmatprep.subr.bf16.mxu0 %v435_v13  ;;  %458 = vmatprep.subr.bf16.mxu1 %v435_v13 }
  0x11   :  { %438 = vmatpush3.bf16.msra.mxu0 %v435_v13  ;;  %466 = vmatpush3.bf16.msra.mxu1 %v435_v13 }
  0x12   :  { %440 = vmatprep.subr.bf16.mxu0 %v439_v16  ;;  %459 = vmatprep.subr.bf16.mxu1 %v439_v16 }
  0x15   :  { %442 = vmatpush3.bf16.msra.mxu0 %v439_v16  ;;  %467 = vmatpush3.bf16.msra.mxu1 %v439_v16 }
  0x16   :  { %444 = vmatprep.subr.bf16.mxu0 %v443_v19  ;;  %460 = vmatprep.subr.bf16.mxu1 %v443_v19 }
  0x19   :  { %446 = vmatpush3.bf16.msra.mxu0 %v443_v19  ;;  %468 = vmatpush3.bf16.msra.mxu1 %v443_v19 }
  0x1a   :  { %448 = vmatprep.subr.bf16.mxu0 %v447_v22  ;;  %461 = vmatprep.subr.bf16.mxu1 %v447_v22 }
  0x1d   :  { %450 = vmatpush3.bf16.msra.mxu0 %v447_v22  ;;  %469 = vmatpush3.bf16.msra.mxu1 %v447_v22 }
  0x1e   :  { %452 = vmatprep.subr.bf16.mxu0 %v451_v25  ;;  %462 = vmatprep.subr.bf16.mxu1 %v451_v25 }
  0x21   :  { %454 = vmatpush3.bf16.msra.mxu0 %v451_v25  ;;  %470 = vmatpush3.bf16.msra.mxu1 %v451_v25 }
  0x24   :  { %400 = vmatmul.mubr.f32.vlgmr.msra.gmra.mrb[0].mxu0 %v25_v26  ;;  %412 = vmatmul.mubr.f32.vlgmr.msra.gmra.mrb[0].mxu1 %v33_v27 }
  0x25   :  { %402 = vmatprep.mubr.f32.mxu0 %v26_v28  ;;  %414 = vmatprep.mubr.f32.mxu1 %v34_v29 }
  0x28   :  { %403 = vmatmul.mubr.f32.gmra.mrb[2].mxu0 %v27_v30  ;;  %415 = vmatmul.mubr.f32.gmra.mrb[2].mxu1 %v35_v31 }
  0x29   :  { %405 = vmatprep.mubr.f32.mxu0 %v28_v32  ;;  %417 = vmatprep.mubr.f32.mxu1 %v36_v33 }
  0x2c   :  { %406 = vmatmul.mubr.f32.gmra.mrb[4].mxu0 %v29_v34  ;;  %418 = vmatmul.mubr.f32.gmra.mrb[4].mxu1 %v37_v35 }
  0x2d   :  { %408 = vmatprep.mubr.f32.mxu0 %v30_v36  ;;  %420 = vmatprep.mubr.f32.mxu1 %v38_v37 }
  0x30   :  { %409 = vmatmul.mubr.f32.gmra.mrb[6].mxu0 %v31_v38  ;;  %421 = vmatmul.mubr.f32.gmra.mrb[6].mxu1 %v39_v39 }
  0xf7   :  { %v401_v42 = vpop.f32.mrb[0].mxu0  ;;  %v413_v43 = vpop.f32.mrb[0].mxu1 }
  0xf8   :  { %v135_v44 = vadd.f32 %v401_v42, %v610_v41  ;;  %v129_v45 = vpop.f32.mrb[1].mxu0  ;;  %v614_v46 = vadd.f32 %v413_v43, %v610_v41  ;;  %v169_v47 = vpop.f32.mrb[1].mxu1 }
  0xf9   :  { %v130_v48 = vadd.f32 %v610_v41, %v129_v45  ;;  %v618_v49 = vadd.f32 %v610_v41, %v169_v47 }
  0xfa   :  { %210 = vst.msk [vmem:[%s767_s3 + $0x8] sm:$0xff] %vm208_vm1, %v135_v44  ;;  %v227_v50 = vsel %vm208_vm1, %v135_v44, 0.0  ;;  %v268_v51 = vmul.f32 %v135_v44, %v135_v44  ;;  %218 = vst.msk [vmem:[%s767_s3 + $0x48] sm:$0xff] %vm208_vm1, %v614_v46 }
  0xfb   :  { %209 = vst.msk [vmem:[%s767_s3] sm:$0xff] %vm208_vm1, %v130_v48  ;;  %v226_v52 = vsel %vm208_vm1, %v130_v48, 0.0  ;;  %v267_v53 = vmul.f32 %v130_v48, %v130_v48  ;;  %v404_v54 = vpop.f32.mrb[2].mxu0  ;;  %217 = vst.msk [vmem:[%s767_s3 + $0x40] sm:$0xff] %vm208_vm1, %v618_v49  ;;  %v416_v55 = vpop.f32.mrb[2].mxu1  ;;  %v275_v34 = vmul.f32 %v618_v49, %v618_v49  ;;  %v241_v45 = vsel %vm208_vm1, %v618_v49, 0.0 }
  0xfc   :  { %v284_v56 = vsel %vm208_vm1, %v268_v51, 0.0  ;;  %v228_v57 = vadd.f32 %v227_v50, %v226_v52  ;;  %v145_v58 = vadd.f32 %v404_v54, %v610_v41  ;;  %v139_v59 = vpop.f32.mrb[3].mxu0  ;;  %v179_v60 = vpop.f32.mrb[3].mxu1  ;;  %v645_v63 = vadd.f32 %v416_v55, %v610_v41 }
  0xfd   :  { %v283_v61 = vsel %vm208_vm1, %v267_v53, 0.0  ;;  %v140_v62 = vadd.f32 %v610_v41, %v139_v59  ;;  %v652_v1 = vadd.f32 %v610_v41, %v179_v60  ;;  %v276_v52 = vmul.f32 %v614_v46, %v614_v46 }
  0xfe   :  { %v285_v0 = vadd.f32 %v284_v56, %v283_v61  ;;  %212 = vst.msk [vmem:[%s767_s3 + $0x18] sm:$0xff] %vm208_vm1, %v145_v58  ;;  %v270_v2 = vmul.f32 %v145_v58, %v145_v58  ;;  %220 = vst.msk [vmem:[%s767_s3 + $0x58] sm:$0xff] %vm208_vm1, %v645_v63  ;;  %v231_v11 = vsel %vm208_vm1, %v145_v58, 0.0  ;;  %v298_v49 = vsel %vm208_vm1, %v275_v34, 0.0 }
  0xff   :  { %211 = vst.msk [vmem:[%s767_s3 + $0x10] sm:$0xff] %vm208_vm1, %v140_v62  ;;  %v229_v3 = vsel %vm208_vm1, %v140_v62, 0.0  ;;  %v269_v4 = vmul.f32 %v140_v62, %v140_v62  ;;  %v407_v5 = vpop.f32.mrb[4].mxu0  ;;  %v419_v6 = vpop.f32.mrb[4].mxu1  ;;  %219 = vst.msk [vmem:[%s767_s3 + $0x50] sm:$0xff] %vm208_vm1, %v652_v1  ;;  %v277_v53 = vmul.f32 %v652_v1, %v652_v1  ;;  %v243_v55 = vsel %vm208_vm1, %v614_v46, 0.0 }
 0x100   :  { %v230_v7 = vadd.f32 %v229_v3, %v228_v57  ;;  %v155_v8 = vadd.f32 %v407_v5, %v610_v41  ;;  %v149_v9 = vpop.f32.mrb[5].mxu0  ;;  %v189_v10 = vpop.f32.mrb[5].mxu1  ;;  %v288_v17 = vsel %vm208_vm1, %v270_v2, 0.0  ;;  %v195_v21 = vadd.f32 %v419_v6, %v610_v41 }
 0x101   :  { %v286_v12 = vsel %vm208_vm1, %v269_v4, 0.0  ;;  %v150_v13 = vadd.f32 %v610_v41, %v149_v9  ;;  %v190_v38 = vadd.f32 %v610_v41, %v189_v10  ;;  %v245_v56 = vsel %vm208_vm1, %v652_v1, 0.0 }
 0x102   :  { %v287_v14 = vadd.f32 %v286_v12, %v285_v0  ;;  %214 = vst.msk [vmem:[%s767_s3 + $0x28] sm:$0xff] %vm208_vm1, %v155_v8  ;;  %v272_v15 = vmul.f32 %v155_v8, %v155_v8  ;;  %v232_v16 = vadd.f32 %v231_v11, %v230_v7  ;;  %v235_v28 = vsel %vm208_vm1, %v155_v8, 0.0  ;;  %222 = vst.msk [vmem:[%s767_s3 + $0x68] sm:$0xff] %vm208_vm1, %v195_v21 }
 0x103   :  { %213 = vst.msk [vmem:[%s767_s3 + $0x20] sm:$0xff] %vm208_vm1, %v150_v13  ;;  %v233_v18 = vsel %vm208_vm1, %v150_v13, 0.0  ;;  %v271_v19 = vmul.f32 %v150_v13, %v150_v13  ;;  %v410_v20 = vpop.f32.mrb[6].mxu0  ;;  %v422_v22 = vpop.f32.mrb[6].mxu1  ;;  %221 = vst.msk [vmem:[%s767_s3 + $0x60] sm:$0xff] %vm208_vm1, %v190_v38  ;;  %v300_v59 = vsel %vm208_vm1, %v276_v52, 0.0  ;;  %v278_v60 = vmul.f32 %v645_v63, %v645_v63 }
 0x104   :  { %v234_v23 = vadd.f32 %v233_v18, %v232_v16  ;;  %v289_v24 = vadd.f32 %v288_v17, %v287_v14  ;;  %v165_v25 = vadd.f32 %v410_v20, %v610_v41  ;;  %v159_v26 = vpop.f32.mrb[7].mxu0  ;;  %v199_v27 = vpop.f32.mrb[7].mxu1  ;;  %v292_v31 = vsel %vm208_vm1, %v272_v15, 0.0 }
 0x105   :  { %v290_v29 = vsel %vm208_vm1, %v271_v19, 0.0  ;;  %v160_v30 = vadd.f32 %v610_v41, %v159_v26  ;;  %v205_v42 = vadd.f32 %v422_v22, %v610_v41  ;;  %v200_v47 = vadd.f32 %v610_v41, %v199_v27 }
 0x106   :  { %v291_v32 = vadd.f32 %v290_v29, %v289_v24  ;;  %216 = vst.msk [vmem:[%s767_s3 + $0x38] sm:$0xff] %vm208_vm1, %v165_v25  ;;  %v236_v33 = vadd.f32 %v235_v28, %v234_v23  ;;  %v274_v35 = vmul.f32 %v165_v25, %v165_v25  ;;  %v239_v43 = vsel %vm208_vm1, %v165_v25, 0.0 }
 0x107   :  { %215 = vst.msk [vmem:[%s767_s3 + $0x30] sm:$0xff] %vm208_vm1, %v160_v30  ;;  %v237_v36 = vsel %vm208_vm1, %v160_v30, 0.0  ;;  %v273_v37 = vmul.f32 %v160_v30, %v160_v30  ;;  %224 = vst.msk [vmem:[%s767_s3 + $0x78] sm:$0xff] %vm208_vm1, %v205_v42  ;;  %v302_v61 = vsel %vm208_vm1, %v277_v53, 0.0  ;;  %v279_v62 = vmul.f32 %v190_v38, %v190_v38 }
 0x108   :  { %v238_v39 = vadd.f32 %v237_v36, %v236_v33  ;;  %v293_v40 = vadd.f32 %v292_v31, %v291_v32  ;;  %v296_v51 = vsel %vm208_vm1, %v274_v35, 0.0  ;;  %223 = vst.msk [vmem:[%s767_s3 + $0x70] sm:$0xff] %vm208_vm1, %v200_v47  ;;  %v247_v3 = vsel %vm208_vm1, %v645_v63, 0.0  ;;  %v225_v33 = vld [vmem:[%s764_s4] sm:$0x1] }
 0x109   :  { %v294_v44 = vsel %vm208_vm1, %v273_v37, 0.0  ;;  %v249_v46 = vsel %vm208_vm1, %v190_v38, 0.0  ;;  %v304_v1 = vsel %vm208_vm1, %v278_v60, 0.0  ;;  %v280_v6 = vmul.f32 %v195_v21, %v195_v21  ;;  %v266_v36 = vld [vmem:[%s765_s5] sm:$0x1] }
 0x10a   :  { %v295_v48 = vadd.f32 %v294_v44, %v293_v40  ;;  %v240_v50 = vadd.f32 %v239_v43, %v238_v39  ;;  %v306_v7 = vsel %vm208_vm1, %v279_v62, 0.0  ;;  %v281_v8 = vmul.f32 %v200_v47, %v200_v47 }
 0x10b   :  { %v251_v11 = vsel %vm208_vm1, %v195_v21, 0.0  ;;  %v253_v12 = vsel %vm208_vm1, %v200_v47, 0.0  ;;  %v308_v63 = vsel %vm208_vm1, %v280_v6, 0.0  ;;  %v282_v15 = vmul.f32 %v205_v42, %v205_v42 }
 0x10c   :  { %v242_v41 = vadd.f32 %v241_v45, %v240_v50  ;;  %v297_v54 = vadd.f32 %v296_v51, %v295_v48  ;;  %v310_v16 = vsel %vm208_vm1, %v281_v8, 0.0  ;;  %v255_v19 = vsel %vm208_vm1, %v205_v42, 0.0 }
 0x10d   :  { %v312_v23 = vsel %vm208_vm1, %v282_v15, 0.0 }
 0x10e   :  { %v299_v57 = vadd.f32 %v298_v49, %v297_v54  ;;  %v244_v58 = vadd.f32 %v243_v55, %v242_v41 }
 0x110   :  { %v246_v0 = vadd.f32 %v245_v56, %v244_v58  ;;  %v301_v2 = vadd.f32 %v300_v59, %v299_v57 }
 0x112   :  { %v303_v4 = vadd.f32 %v302_v61, %v301_v2  ;;  %v248_v5 = vadd.f32 %v247_v3, %v246_v0 }
 0x114   :  { %v250_v9 = vadd.f32 %v249_v46, %v248_v5  ;;  %v305_v10 = vadd.f32 %v304_v1, %v303_v4 }
 0x116   :  { %v307_v13 = vadd.f32 %v306_v7, %v305_v10  ;;  %v252_v14 = vadd.f32 %v251_v11, %v250_v9 }
 0x118   :  { %v254_v17 = vadd.f32 %v253_v12, %v252_v14  ;;  %v309_v18 = vadd.f32 %v308_v63, %v307_v13 }
 0x11a   :  { %v256_v20 = vadd.f32 %v255_v19, %v254_v17  ;;  %v311_v22 = vadd.f32 %v310_v16, %v309_v18 }
 0x11c   :  { %v257_v24 = vrot.slane %v256_v20, 4  ;;  %v313_v25 = vadd.f32 %v312_v23, %v311_v22 }
 0x11e   :  { %v258_v21 = vadd.f32 %v257_v24, %v256_v20  ;;  %v314_v26 = vrot.slane %v313_v25, 4 }
 0x120   :  { %v259_v27 = vrot.slane %v258_v21, 2  ;;  %v315_v28 = vadd.f32 %v314_v26, %v313_v25 }
 0x122   :  { %v260_v29 = vadd.f32 %v259_v27, %v258_v21  ;;  %v316_v30 = vrot.slane %v315_v28, 2 }
 0x124   :  { %v261_v31 = vrot.slane %v260_v29, 1  ;;  %v317_v32 = vadd.f32 %v316_v30, %v315_v28 }
 0x126   :  { %v262_v34 = vadd.f32 %v261_v31, %v260_v29  ;;  %v318_v35 = vrot.slane %v317_v32, 1 }
 0x128   :  { %v263_v37 = vadd.f32 %v262_v34, %v225_v33  ;;  %v319_v38 = vadd.f32 %v318_v35, %v317_v32 }
 0x12a   :  { %265 = vst.msk [vmem:[%s764_s4] sm:$0x1] %vm21_vm0, %v263_v37  ;;  %v320_v39 = vadd.f32 %v319_v38, %v266_v36 }
 0x12c   :  { %321 = vst.msk [vmem:[%s765_s5] sm:$0x1] %vm21_vm0, %v320_v39 }

// kernel: discriminator_forward.7
= control target key start
LH: loop header
LB: loop body
LE: loop exit
PB: predicated region body
PF: predicated region fallthrough
CT: control target
= control target key end

     0   :  { %s342_s12 = smov 0   ;;  %s380_s0 = inlined_call_operand.vmem [shape: f32[128,16], index: 0, kind: input, shape index: {}]   ;;  %s381_s1 = inlined_call_operand.vmem [shape: f32[1,16], index: 1, kind: input, shape index: {}]   ;;  %s382_s2 = inlined_call_operand.vmem [shape: f32[1,16], index: 2, kind: input, shape index: {}]   ;;  %s383_s3 = inlined_call_operand.vmem [shape: f32[128,16], index: 3, kind: output, shape index: {}]  }
   0x1 LB: > { %s293_s13 = sadd.s32 4294967295, %s320_s12   ;;  %p297_p0 = scmp.ge.s32.totalorder %s320_s12, 1  ;;  %s320_s12 = sphi %s342_s12, %s13_s12  }
   0x2   : > { %p138_p1 = scmp.lt.s32.totalorder %s320_s12, 3 }
   0x4   : > { %p139_p2 = pnand %p297_p0, %p138_p1 }
   0x5   : > { %s298_s14 = sshll.u32 (!%p139_p2), %s293_s13, 3  ;;  %v302_v0 = vld [vmem:[%s381_s1] ss:$0 sm:$0xff] (!%p139_p2)  ;;  %vm228_vm0 = vcmask (!%p139_p2), 130048  }
   0x6   : > { %142 = sbr.rel (%p139_p2) target bundleno = 29 (0x1d), region = 32  ;;  %p163_p3 = scmp.lt.s32.totalorder (!%p139_p2), %s298_s14, 15  ;;  %v303_v1 = vld [vmem:[%s382_s2] ss:$0 sm:$0xff] (!%p139_p2) }
   0xd   : > { %s385_s14 = smov (!%p163_p3, %s298_s14), 15 }
   0xe   : > { %s299_s15 = sshll.u32 %s385_s14, 3 }
   0xf   : > { %s166_s20 = scalar_lea.vmem %s380_s0, %s299_s15  ;;  %s172_s25 = scalar_lea.vmem %s383_s3, %s299_s15 }
  0x10   : > { %v174_v2 = vld [vmem:[%s166_s20] sm:$0xff]  ;;  %v175_v3 = vld [vmem:[%s166_s20 + $0x8] sm:$0xff]  ;;  %v176_v4 = vld [vmem:[%s166_s20 + $0x10] sm:$0xff] }
  0x11   : > { %v189_v5 = vmul.f32 %v302_v0, %v174_v2  ;;  %v190_v6 = vmul.f32 %v302_v0, %v175_v3  ;;  %v191_v7 = vmul.f32 %v302_v0, %v176_v4  ;;  %v177_v8 = vld [vmem:[%s166_s20 + $0x18] sm:$0xff]  ;;  %v178_v9 = vld [vmem:[%s166_s20 + $0x20] sm:$0xff]  ;;  %v179_v10 = vld [vmem:[%s166_s20 + $0x28] sm:$0xff] }
  0x12   : > { %v192_v11 = vmul.f32 %v302_v0, %v177_v8  ;;  %v193_v12 = vmul.f32 %v302_v0, %v178_v9  ;;  %v194_v13 = vmul.f32 %v302_v0, %v179_v10  ;;  %v180_v14 = vld [vmem:[%s166_s20 + $0x30] sm:$0xff]  ;;  %v181_v15 = vld [vmem:[%s166_s20 + $0x38] sm:$0xff] }
  0x13   : > { %v204_v16 = vadd.f32 %v303_v1, %v189_v5  ;;  %v205_v17 = vadd.f32 %v303_v1, %v190_v6  ;;  %v206_v18 = vadd.f32 %v303_v1, %v191_v7  ;;  %v195_v19 = vmul.f32 %v302_v0, %v180_v14 }
  0x14   : > { %v207_v20 = vadd.f32 %v303_v1, %v192_v11  ;;  %v208_v21 = vadd.f32 %v303_v1, %v193_v12  ;;  %v209_v22 = vadd.f32 %v303_v1, %v194_v13  ;;  %v196_v23 = vmul.f32 %v302_v0, %v181_v15 }
  0x15   : > { %v212_v24 = vmul.f32 0.2, %v204_v16  ;;  %v213_v25 = vmul.f32 0.2, %v205_v17  ;;  %v214_v26 = vmul.f32 0.2, %v206_v18  ;;  %v210_v27 = vadd.f32 %v303_v1, %v195_v19 }
  0x16   : > { %v215_v28 = vmul.f32 0.2, %v207_v20  ;;  %v216_v29 = vmul.f32 0.2, %v208_v21  ;;  %v217_v30 = vmul.f32 0.2, %v209_v22  ;;  %v211_v31 = vadd.f32 %v303_v1, %v196_v23 }
  0x17   : > { %v220_v32 = vmax.f32 %v204_v16, %v212_v24  ;;  %v221_v33 = vmax.f32 %v205_v17, %v213_v25  ;;  %v222_v34 = vmax.f32 %v206_v18, %v214_v26  ;;  %v218_v35 = vmul.f32 0.2, %v210_v27 }
  0x18   : > { %v223_v36 = vmax.f32 %v207_v20, %v215_v28  ;;  %v224_v37 = vmax.f32 %v208_v21, %v216_v29  ;;  %v225_v38 = vmax.f32 %v209_v22, %v217_v30  ;;  %v219_v39 = vmul.f32 0.2, %v211_v31 }
  0x19   : > { %229 = vst.msk [vmem:[%s172_s25] sm:$0xff] %vm228_vm0, %v220_v32  ;;  %230 = vst.msk [vmem:[%s172_s25 + $0x8] sm:$0xff] %vm228_vm0, %v221_v33  ;;  %v226_v40 = vmax.f32 %v210_v27, %v218_v35 }
  0x1a   : > { %231 = vst.msk [vmem:[%s172_s25 + $0x10] sm:$0xff] %vm228_vm0, %v222_v34  ;;  %232 = vst.msk [vmem:[%s172_s25 + $0x18] sm:$0xff] %vm228_vm0, %v223_v36  ;;  %v227_v41 = vmax.f32 %v211_v31, %v219_v39 }
  0x1b   : > { %233 = vst.msk [vmem:[%s172_s25 + $0x20] sm:$0xff] %vm228_vm0, %v224_v37  ;;  %234 = vst.msk [vmem:[%s172_s25 + $0x28] sm:$0xff] %vm228_vm0, %v225_v38 }
  0x1c   : > { %235 = vst.msk [vmem:[%s172_s25 + $0x30] sm:$0xff] %vm228_vm0, %v226_v40  ;;  %236 = vst.msk [vmem:[%s172_s25 + $0x38] sm:$0xff] %vm228_vm0, %v227_v41 }
  0x1d PF: > { %s13_s12 = sadd.s32 1, %s320_s12  }
  0x1e   : > { %p10_p4 = scmp.ge.s32.totalorder %s13_s12, 4  }
  0x20   :  { %12 = sbr.rel (!%p10_p4) target bundleno = 1 (0x1), region = 62 }

// kernel: discriminator_forward.8
= control target key start
LH: loop header
LB: loop body
LE: loop exit
PB: predicated region body
PF: predicated region fallthrough
CT: control target
= control target key end

     0   :  { %vm21_vm0 = vcmask 253952   ;;  %v304_v56 = vmov 0.0   ;;  %vm156_vm1 = vcmask 261120   ;;  %s504_s1 = inlined_call_operand.vmem [shape: f32[256,32], index: 1, kind: input, shape index: {}]   ;;  %s505_s0 = inlined_call_operand.vmem [shape: f32[32,256], index: 0, kind: input, shape index: {}]   ;;  %s506_s4 = inlined_call_operand.vmem [shape: f32[1,32], index: 4, kind: output, shape index: {1}]   ;;  %s507_s5 = inlined_call_operand.vmem [shape: f32[1,32], index: 5, kind: output, shape index: {2}]   ;;  %s508_s2 = inlined_call_operand.vmem [shape: f32[1,32], index: 2, kind: input, shape index: {}]   ;;  %s509_s3 = inlined_call_operand.vmem [shape: f32[32,32], index: 3, kind: output, shape index: {0}]  }
   0x1   :  { %v48_v0 = vld [vmem:[%s504_s1 + $0x80] sm:$0xff]  ;;  %v49_v1 = vld [vmem:[%s504_s1 + $0x88] sm:$0xff]  ;;  %v50_v5 = vld [vmem:[%s504_s1 + $0x90] sm:$0xff]  ;;  %22 = vst.msk [vmem:[%s506_s4] sm:$0x1] %vm21_vm0, %v304_v56 }
   0x2   :  { %v32_v2 = vld [vmem:[%s504_s1] sm:$0xff]  ;;  %v255_v3 = vpack.c.bf16 %v49_v1, %v48_v0  ;;  %v33_v4 = vld [vmem:[%s504_s1 + $0x8] sm:$0xff]  ;;  %v51_v6 = vld [vmem:[%s504_s1 + $0x98] sm:$0xff]  ;;  %23 = vst.msk [vmem:[%s507_s5] sm:$0x1] %vm21_vm0, %v304_v56 }
   0x3   :  { %v257_v7 = vpack.c.bf16 %v33_v4, %v32_v2  ;;  %v259_v8 = vpack.c.bf16 %v51_v6, %v50_v5  ;;  %v34_v9 = vld [vmem:[%s504_s1 + $0x10] sm:$0xff]  ;;  %v35_v10 = vld [vmem:[%s504_s1 + $0x18] sm:$0xff]  ;;  %v52_v11 = vld [vmem:[%s504_s1 + $0xa0] sm:$0xff] }
   0x4   :  { %256 = vmatprep.subr.bf16.mxu0 %v255_v3  ;;  %287 = vmatprep.subr.bf16.mxu1 %v255_v3  ;;  %v53_v12 = vld [vmem:[%s504_s1 + $0xa8] sm:$0xff]  ;;  %v261_v13 = vpack.c.bf16 %v35_v10, %v34_v9  ;;  %v36_v15 = vld [vmem:[%s504_s1 + $0x20] sm:$0xff]  ;;  %v54_v17 = vld [vmem:[%s504_s1 + $0xb0] sm:$0xff] }
   0x5   :  { %258 = vmatpush3.bf16.msra.mxu0 %v257_v7  ;;  %295 = vmatpush3.bf16.msra.mxu1 %v257_v7  ;;  %v263_v14 = vpack.c.bf16 %v53_v12, %v52_v11  ;;  %v37_v16 = vld [vmem:[%s504_s1 + $0x28] sm:$0xff]  ;;  %v55_v18 = vld [vmem:[%s504_s1 + $0xb8] sm:$0xff]  ;;  %v38_v21 = vld [vmem:[%s504_s1 + $0x30] sm:$0xff] }
   0x6   :  { %260 = vmatprep.subr.bf16.mxu0 %v259_v8  ;;  %288 = vmatprep.subr.bf16.mxu1 %v259_v8  ;;  %v265_v19 = vpack.c.bf16 %v37_v16, %v36_v15  ;;  %v267_v20 = vpack.c.bf16 %v55_v18, %v54_v17  ;;  %v39_v22 = vld [vmem:[%s504_s1 + $0x38] sm:$0xff]  ;;  %v56_v23 = vld [vmem:[%s504_s1 + $0xc0] sm:$0xff]  ;;  %v57_v24 = vld [vmem:[%s504_s1 + $0xc8] sm:$0xff] }
   0x7   :  { %v25_v25 = vld [vmem:[%s505_s0 + $0x8] sm:$0xff]  ;;  %v269_v27 = vpack.c.bf16 %v39_v22, %v38_v21  ;;  %v271_v28 = vpack.c.bf16 %v57_v24, %v56_v23  ;;  %v40_v29 = vld [vmem:[%s504_s1 + $0x40] sm:$0xff]  ;;  %v58_v31 = vld [vmem:[%s504_s1 + $0xd0] sm:$0xff] }
   0x8   :  { %135 = vmatprep.mubr.f32.mxu0 %v25_v25  ;;  %v29_v26 = vld [vmem:[%s505_s0 + $0x28] sm:$0xff]  ;;  %v59_v32 = vld [vmem:[%s504_s1 + $0xd8] sm:$0xff]  ;;  %v42_v35 = vld [vmem:[%s504_s1 + $0x50] sm:$0xff] }
   0x9   :  { %262 = vmatpush3.bf16.msra.mxu0 %v261_v13  ;;  %296 = vmatpush3.bf16.msra.mxu1 %v261_v13  ;;  %v41_v30 = vld [vmem:[%s504_s1 + $0x48] sm:$0xff]  ;;  %v275_v34 = vpack.c.bf16 %v59_v32, %v58_v31  ;;  %v43_v36 = vld [vmem:[%s504_s1 + $0x58] sm:$0xff]  ;;  %v60_v37 = vld [vmem:[%s504_s1 + $0xe0] sm:$0xff] }
   0xa   :  { %264 = vmatprep.subr.bf16.mxu0 %v263_v14  ;;  %289 = vmatprep.subr.bf16.mxu1 %v263_v14  ;;  %v273_v33 = vpack.c.bf16 %v41_v30, %v40_v29  ;;  %v61_v38 = vld [vmem:[%s504_s1 + $0xe8] sm:$0xff]  ;;  %v277_v39 = vpack.c.bf16 %v43_v36, %v42_v35  ;;  %v44_v41 = vld [vmem:[%s504_s1 + $0x60] sm:$0xff]  ;;  %v62_v43 = vld [vmem:[%s504_s1 + $0xf0] sm:$0xff] }
   0xb   :  { %145 = vmatprep.mubr.f32.mxu1 %v29_v26  ;;  %v279_v40 = vpack.c.bf16 %v61_v38, %v60_v37  ;;  %v45_v42 = vld [vmem:[%s504_s1 + $0x68] sm:$0xff]  ;;  %v63_v44 = vld [vmem:[%s504_s1 + $0xf8] sm:$0xff]  ;;  %v46_v47 = vld [vmem:[%s504_s1 + $0x70] sm:$0xff] }
   0xc   :  { %v281_v45 = vpack.c.bf16 %v45_v42, %v44_v41  ;;  %v283_v46 = vpack.c.bf16 %v63_v44, %v62_v43  ;;  %v47_v48 = vld [vmem:[%s504_s1 + $0x78] sm:$0xff]  ;;  %v24_v50 = vld [vmem:[%s505_s0] sm:$0xff]  ;;  %v26_v54 = vld [vmem:[%s505_s0 + $0x10] sm:$0xff] }
   0xd   :  { %266 = vmatpush3.bf16.msra.mxu0 %v265_v19  ;;  %297 = vmatpush3.bf16.msra.mxu1 %v265_v19  ;;  %v285_v49 = vpack.c.bf16 %v47_v48, %v46_v47  ;;  %v28_v51 = vld [vmem:[%s505_s0 + $0x20] sm:$0xff]  ;;  %v27_v52 = vld [vmem:[%s505_s0 + $0x18] sm:$0xff]  ;;  %v30_v55 = vld [vmem:[%s505_s0 + $0x30] sm:$0xff] }
   0xe   :  { %268 = vmatprep.subr.bf16.mxu0 %v267_v20  ;;  %290 = vmatprep.subr.bf16.mxu1 %v267_v20  ;;  %v31_v53 = vld [vmem:[%s505_s0 + $0x38] sm:$0xff]  ;;  %v210_v59 = vld [vmem:[%s508_s2] ss:$0 sm:$0xff] }
   0xf   :  { %v161_v37 = vld [vmem:[%s506_s4] sm:$0x1] }
  0x11   :  { %270 = vmatpush3.bf16.msra.mxu0 %v269_v27  ;;  %298 = vmatpush3.bf16.msra.mxu1 %v269_v27 }
  0x12   :  { %272 = vmatprep.subr.bf16.mxu0 %v271_v28  ;;  %291 = vmatprep.subr.bf16.mxu1 %v271_v28 }
  0x15   :  { %274 = vmatpush3.bf16.msra.mxu0 %v273_v33  ;;  %299 = vmatpush3.bf16.msra.mxu1 %v273_v33 }
  0x16   :  { %276 = vmatprep.subr.bf16.mxu0 %v275_v34  ;;  %292 = vmatprep.subr.bf16.mxu1 %v275_v34 }
  0x19   :  { %278 = vmatpush3.bf16.msra.mxu0 %v277_v39  ;;  %300 = vmatpush3.bf16.msra.mxu1 %v277_v39 }
  0x1a   :  { %280 = vmatprep.subr.bf16.mxu0 %v279_v40  ;;  %293 = vmatprep.subr.bf16.mxu1 %v279_v40  ;;  %v178_v40 = vld [vmem:[%s507_s5] sm:$0x1] }
  0x1d   :  { %282 = vmatpush3.bf16.msra.mxu0 %v281_v45  ;;  %301 = vmatpush3.bf16.msra.mxu1 %v281_v45 }
  0x1e   :  { %284 = vmatprep.subr.bf16.mxu0 %v283_v46  ;;  %294 = vmatprep.subr.bf16.mxu1 %v283_v46 }
  0x21   :  { %286 = vmatpush3.bf16.msra.mxu0 %v285_v49  ;;  %302 = vmatpush3.bf16.msra.mxu1 %v285_v49 }
  0x24   :  { %136 = vmatmul.mubr.f32.vlgmr.msra.gmra.mrb[0].mxu0 %v24_v50  ;;  %146 = vmatmul.mubr.f32.vlgmr.msra.gmra.mrb[0].mxu1 %v28_v51 }
  0x25   :  { %140 = vmatprep.mubr.f32.mxu0 %v27_v52  ;;  %150 = vmatprep.mubr.f32.mxu1 %v31_v53 }
  0x28   :  { %141 = vmatmul.mubr.f32.gmra.mrb[2].mxu0 %v26_v54  ;;  %151 = vmatmul.mubr.f32.gmra.mrb[2].mxu1 %v30_v55 }
  0xf7   :  { %v243_v57 = vpop.f32.mrb[0].mxu0  ;;  %v249_v58 = vpop.f32.mrb[0].mxu1 }
  0xf8   :  { %v244_v60 = vpop.f32.mrb[1].mxu0  ;;  %v250_v61 = vpop.f32.mrb[1].mxu1 }
  0xf9   :  { %v245_v62 = vadd.f32 %v244_v60, %v243_v57  ;;  %v251_v63 = vadd.f32 %v250_v61, %v249_v58 }
  0xfb   :  { %v138_v0 = vadd.f32 %v245_v62, %v210_v59  ;;  %v246_v1 = vpop.f32.mrb[2].mxu0  ;;  %v148_v2 = vadd.f32 %v251_v63, %v210_v59  ;;  %v252_v3 = vpop.f32.mrb[2].mxu1 }
  0xfc   :  { %v247_v4 = vpop.f32.mrb[3].mxu0  ;;  %v253_v5 = vpop.f32.mrb[3].mxu1 }
  0xfd   :  { %157 = vst.msk [vmem:[%s509_s3] sm:$0xff] %vm156_vm1, %v138_v0  ;;  %159 = vst.msk [vmem:[%s509_s3 + $0x10] sm:$0xff] %vm156_vm1, %v148_v2  ;;  %v248_v6 = vadd.f32 %v247_v4, %v246_v1  ;;  %v254_v7 = vadd.f32 %v253_v5, %v252_v3  ;;  %v179_v8 = vmul.f32 %v138_v0, %v138_v0  ;;  %v162_v11 = vsel %vm156_vm1, %v138_v0, 0.0 }
  0xfe   :  { %v181_v12 = vmul.f32 %v148_v2, %v148_v2  ;;  %v165_v18 = vsel %vm156_vm1, %v148_v2, 0.0 }
  0xff   :  { %v143_v9 = vadd.f32 %v248_v6, %v210_v59  ;;  %v153_v10 = vadd.f32 %v254_v7, %v210_v59  ;;  %v183_v17 = vsel %vm156_vm1, %v179_v8, 0.0 }
 0x100   :  { %v186_v23 = vsel %vm156_vm1, %v181_v12, 0.0 }
 0x101   :  { %158 = vst.msk [vmem:[%s509_s3 + $0x8] sm:$0xff] %vm156_vm1, %v143_v9  ;;  %v163_v13 = vsel %vm156_vm1, %v143_v9, 0.0  ;;  %v180_v14 = vmul.f32 %v143_v9, %v143_v9  ;;  %160 = vst.msk [vmem:[%s509_s3 + $0x18] sm:$0xff] %vm156_vm1, %v153_v10  ;;  %v182_v15 = vmul.f32 %v153_v10, %v153_v10  ;;  %v167_v20 = vsel %vm156_vm1, %v153_v10, 0.0 }
 0x102   :  { %v164_v16 = vadd.f32 %v163_v13, %v162_v11 }
 0x103   :  { %v184_v19 = vsel %vm156_vm1, %v180_v14, 0.0  ;;  %v188_v24 = vsel %vm156_vm1, %v182_v15, 0.0 }
 0x104   :  { %v185_v21 = vadd.f32 %v184_v19, %v183_v17  ;;  %v166_v22 = vadd.f32 %v165_v18, %v164_v16 }
 0x106   :  { %v168_v25 = vadd.f32 %v167_v20, %v166_v22  ;;  %v187_v26 = vadd.f32 %v186_v23, %v185_v21 }
 0x108   :  { %v169_v27 = vrot.slane %v168_v25, 4  ;;  %v189_v28 = vadd.f32 %v188_v24, %v187_v26 }
 0x10a   :  { %v170_v29 = vadd.f32 %v169_v27, %v168_v25  ;;  %v190_v30 = vrot.slane %v189_v28, 4 }
 0x10c   :  { %v171_v31 = vrot.slane %v170_v29, 2  ;;  %v191_v32 = vadd.f32 %v190_v30, %v189_v28 }
 0x10e   :  { %v172_v33 = vadd.f32 %v171_v31, %v170_v29  ;;  %v192_v34 = vrot.slane %v191_v32, 2 }
 0x110   :  { %v173_v35 = vrot.slane %v172_v33, 1  ;;  %v193_v36 = vadd.f32 %v192_v34, %v191_v32 }
 0x112   :  { %v174_v38 = vadd.f32 %v173_v35, %v172_v33  ;;  %v194_v39 = vrot.slane %v193_v36, 1 }
 0x114   :  { %v175_v41 = vadd.f32 %v174_v38, %v161_v37  ;;  %v195_v42 = vadd.f32 %v194_v39, %v193_v36 }
 0x116   :  { %177 = vst.msk [vmem:[%s506_s4] sm:$0x1] %vm21_vm0, %v175_v41  ;;  %v196_v43 = vadd.f32 %v195_v42, %v178_v40 }
 0x118   :  { %197 = vst.msk [vmem:[%s507_s5] sm:$0x1] %vm21_vm0, %v196_v43 }

// kernel: discriminator_forward.9
= control target key start
LH: loop header
LB: loop body
LE: loop exit
PB: predicated region body
PF: predicated region fallthrough
CT: control target
= control target key end

     0   :  { %vm62_vm0 = vcmask 261120   ;;  %vm83_vm1 = vcmask 1041409   ;;  %vm86_vm2 = vcmask 254976   ;;  %vm104_vm3 = vcmask 1024   ;;  %s177_s0 = inlined_call_operand.vmem [shape: f32[32,32], index: 0, kind: input, shape index: {}]   ;;  %s178_s1 = inlined_call_operand.vmem [shape: f32[1,32], index: 1, kind: input, shape index: {}]   ;;  %s179_s2 = inlined_call_operand.vmem [shape: f32[1,32], index: 2, kind: input, shape index: {}]   ;;  %s180_s4 = inlined_call_operand.<no memory space> [shape: f32[1,1], index: 4, kind: input, shape index: {}]   ;;  %s181_s3 = inlined_call_operand.vmem [shape: f32[16,32], index: 3, kind: input, shape index: {}]   ;;  %s182_s5 = inlined_call_operand.vmem [shape: f32[2,1], index: 5, kind: output, shape index: {}]  }
   0x1   :  { %v22_v0 = vld [vmem:[%s177_s0] sm:$0xff]  ;;  %v23_v1 = vld [vmem:[%s177_s0 + $0x8] sm:$0xff]  ;;  %v24_v2 = vld [vmem:[%s177_s0 + $0x10] sm:$0xff]  ;;  %v10_v3 = vstv %s180_s4 }
   0x2   :  { %v25_v4 = vld [vmem:[%s177_s0 + $0x18] sm:$0xff]  ;;  %v110_v5 = vld [vmem:[%s178_s1] ss:$0 sm:$0xff]  ;;  %11 = vst [vmem:[#allocation2] sm:$0x1] %v10_v3  ;;  %v57_v20 = vld [vmem:[%s181_s3 + $0x8] sm:$0xff] }
   0x3   :  { %v111_v6 = vld [vmem:[%s179_s2] ss:$0 sm:$0xff]  ;;  %v33_v7 = vmul.f32 %v110_v5, %v22_v0  ;;  %v34_v8 = vmul.f32 %v110_v5, %v23_v1  ;;  %v35_v9 = vmul.f32 %v110_v5, %v24_v2  ;;  %v36_v10 = vmul.f32 %v110_v5, %v25_v4 }
   0x4   :  { %v56_v19 = vld [vmem:[%s181_s3] sm:$0xff] }
   0x5   :  { %v44_v11 = vadd.f32 %v111_v6, %v33_v7  ;;  %v45_v12 = vadd.f32 %v111_v6, %v34_v8  ;;  %v46_v13 = vadd.f32 %v111_v6, %v35_v9  ;;  %v47_v14 = vadd.f32 %v111_v6, %v36_v10 }
   0x7   :  { %v48_v15 = vmul.f32 0.2, %v44_v11  ;;  %v49_v16 = vmul.f32 0.2, %v45_v12  ;;  %v50_v17 = vmul.f32 0.2, %v46_v13 }
   0x8   :  { %v51_v18 = vmul.f32 0.2, %v47_v14 }
   0x9   :  { %v52_v21 = vmax.f32 %v44_v11, %v48_v15  ;;  %v53_v22 = vmax.f32 %v45_v12, %v49_v16  ;;  %v54_v23 = vmax.f32 %v46_v13, %v50_v17  ;;  %v112_v49 = vld [vmem:[#allocation2] ss:$0 sm:$0xff] }
   0xa   :  { %v55_v24 = vmax.f32 %v47_v14, %v51_v18 }
   0xb   :  { %v58_v25 = vmul.f32 %v56_v19, %v52_v21  ;;  %v59_v26 = vmul.f32 %v57_v20, %v53_v22  ;;  %v60_v27 = vmul.f32 %v56_v19, %v54_v23 }
   0xc   :  { %v61_v28 = vmul.f32 %v57_v20, %v55_v24 }
   0xd   :  { %v63_v29 = vsel %vm62_vm0, %v58_v25, 0.0  ;;  %v64_v30 = vsel %vm62_vm0, %v59_v26, 0.0  ;;  %v72_v31 = vsel %vm62_vm0, %v60_v27, 0.0 }
   0xe   :  { %v65_v32 = vadd.f32 %v64_v30, %v63_v29  ;;  %v73_v33 = vsel %vm62_vm0, %v61_v28, 0.0 }
   0xf   :  { %v74_v34 = vadd.f32 %v73_v33, %v72_v31 }
  0x10   :  { %v66_v35 = vrot.slane %v65_v32, 4 }
  0x11   :  { %v75_v36 = vrot.slane %v74_v34, 4 }
  0x12   :  { %v67_v37 = vadd.f32 %v66_v35, %v65_v32 }
  0x13   :  { %v76_v38 = vadd.f32 %v75_v36, %v74_v34 }
  0x14   :  { %v68_v39 = vrot.slane %v67_v37, 2 }
  0x15   :  { %v77_v40 = vrot.slane %v76_v38, 2 }
  0x16   :  { %v69_v41 = vadd.f32 %v68_v39, %v67_v37 }
  0x17   :  { %v78_v42 = vadd.f32 %v77_v40, %v76_v38 }
  0x18   :  { %v70_v43 = vrot.slane %v69_v41, 1 }
  0x19   :  { %v79_v44 = vrot.slane %v78_v42, 1 }
  0x1a   :  { %v71_v45 = vadd.f32 %v70_v43, %v69_v41 }
  0x1b   :  { %v80_v46 = vadd.f32 %v79_v44, %v78_v42 }
  0x1d   :  { %v84_v47 = vsel %vm83_vm1, %v80_v46, %v71_v45 }
  0x1e   :  { %v87_v48 = vsel %vm86_vm2, %v84_v47, 0.0 }
  0x1f   :  { %88 = vadd.xlane.f32.xlu0 %v87_v48 }
  0xac   :  { %v89_v50 = vpop.xlane.xlu0 %88 }
  0xad   :  { %v97_v51 = vadd.f32 %v112_v49, %v89_v50 }
  0xaf   :  { %v98_v52 = vsub.f32 0.0, %v97_v51 }
  0xb1   :  { %v99_v53 = vmul.f32 1.442695, %v98_v52 }
  0xb3   :  { %113 = vpow2.f32 %v99_v53 }
  0xbd   :  { %v114_v54 = vpop.eup %113 }
  0xbe   :  { %v101_v55 = vadd.f32 1.0, %v114_v54 }
  0xc0   :  { %115 = vrcp.f32 %v101_v55 }
  0xca   :  { %v116_v56 = vpop.eup %115 }
  0xcb   :  { %105 = vst.msk [vmem:[%s182_s5] sm:$0x3] %vm104_vm3, %v116_v56 }

</bundles_post_ra>
